<compile_context>
chip_gen: v5e
topology: v5e:2x2
jax: 0.10.0
libtpu: 0.0.40
codegen_flags: <defaults>
</compile_context>

<pallas_src>
import functools

import jax
import jax.numpy as jnp
from jax.experimental import pallas as pl
from jax.experimental.pallas import tpu as pltpu

_NEG_BIG = jnp.float32(-1e30)  # softmax mask value for padded output columns


def _round_up(n, m):
    return ((n + m - 1) // m) * m


def highway_fc_kernel(x_ref, wd_ref, bd_ref, wh_ref, bh_ref, wt_ref, bt_ref,
                      wl_ref, bl_ref, o_ref, *, num_layers):
    mm_dtype = wd_ref.dtype  # bf16 matmul operands, f32 accumulation

    # ---- dimChange + ReLU -------------------------------------------------
    x = x_ref[...].astype(mm_dtype)
    h = jnp.dot(x, wd_ref[...], preferred_element_type=jnp.float32) + bd_ref[...]
    h = jnp.maximum(h, 0.0)  # carried in f32

    # ---- highway layers ---------------------------------------------------
    def layer(l, h):
        hb = h.astype(mm_dtype)
        plain = jnp.dot(hb, wh_ref[l],
                        preferred_element_type=jnp.float32) + bh_ref[l]
        plain = jnp.maximum(plain, 0.0)
        gate_logits = jnp.dot(hb, wt_ref[l],
                              preferred_element_type=jnp.float32) + bt_ref[l]
        gate = jax.nn.sigmoid(gate_logits)  # EUP logistic, no f32 divide
        return gate * plain + (1.0 - gate) * h

    if num_layers <= 4:
        # small depth: static unroll (weights indexed with Python ints)
        for l in range(num_layers):
            h = layer(l, h)
    else:
        # large depth: bound vreg live ranges, dynamic index into (L, H, H)
        h = jax.lax.fori_loop(0, num_layers, layer, h)

    # ---- final linear + masked, stable softmax over last dim --------------
    logits = jnp.dot(h.astype(mm_dtype), wl_ref[...],
                     preferred_element_type=jnp.float32) + bl_ref[...]
    m = jnp.max(logits, axis=-1, keepdims=True)
    e = jnp.exp(logits - m)               # padded cols: exp(-1e30 - m) == 0
    denom = jnp.sum(e, axis=-1, keepdims=True)
    o_ref[...] = (e * pl.reciprocal(denom, approx=True)).astype(o_ref.dtype)


def highway_fc_model(x, params, *, num_layers, block_b=128,
                     matmul_dtype=jnp.bfloat16):
    """Run the HighwayFcModel forward pass as one batched Pallas kernel."""
    wd, bd, wh, bh, wt, bt, wl, bl = params
    B, in_dims = x.shape
    hidden = wd.shape[1]
    out_size = wl.shape[1]

    # Lane-dense padded sizes.
    Dp = _round_up(in_dims, 128)
    Hp = _round_up(hidden, 128)
    Op = _round_up(out_size, 128)
    Bp = _round_up(B, block_b)

    # ---- pad & cast parameters (zeros in padded rows/cols keep padded lanes
    # ---- of h at exactly 0; padded output logits are masked via bias) ------
    x_p = jnp.pad(x, ((0, Bp - B), (0, Dp - in_dims))).astype(jnp.float32)
    wd_p = jnp.pad(wd, ((0, Dp - in_dims), (0, Hp - hidden))).astype(matmul_dtype)
    bd_p = jnp.pad(bd, ((0, 0), (0, Hp - hidden))).astype(jnp.float32)
    wh_p = jnp.pad(wh, ((0, 0), (0, Hp - hidden), (0, Hp - hidden))).astype(matmul_dtype)
    bh_p = jnp.pad(bh, ((0, 0), (0, 0), (0, Hp - hidden))).astype(jnp.float32)
    wt_p = jnp.pad(wt, ((0, 0), (0, Hp - hidden), (0, Hp - hidden))).astype(matmul_dtype)
    bt_p = jnp.pad(bt, ((0, 0), (0, 0), (0, Hp - hidden))).astype(jnp.float32)
    wl_p = jnp.pad(wl, ((0, Hp - hidden), (0, Op - out_size))).astype(matmul_dtype)
    bl_p = jnp.pad(bl, ((0, 0), (0, Op - out_size)),
                   constant_values=_NEG_BIG).astype(jnp.float32)

    const2 = lambda i: (0, 0)
    const3 = lambda i: (0, 0, 0)

    kernel = functools.partial(highway_fc_kernel, num_layers=num_layers)

    out_p = pl.pallas_call(
        kernel,
        out_shape=jax.ShapeDtypeStruct((Bp, Op), jnp.float32),
        grid=(Bp // block_b,),
        in_specs=[
            pl.BlockSpec((block_b, Dp), lambda i: (i, 0)),        # x tile
            pl.BlockSpec((Dp, Hp), const2),                       # wd (resident)
            pl.BlockSpec((1, Hp), const2),                        # bd
            pl.BlockSpec((num_layers, Hp, Hp), const3),           # wh stack
            pl.BlockSpec((num_layers, 1, Hp), const3),            # bh stack
            pl.BlockSpec((num_layers, Hp, Hp), const3),           # wt stack
            pl.BlockSpec((num_layers, 1, Hp), const3),            # bt stack
            pl.BlockSpec((Hp, Op), const2),                       # wl
            pl.BlockSpec((1, Op), const2),                        # bl
        ],
        out_specs=pl.BlockSpec((block_b, Op), lambda i: (i, 0)),  # lane-dense
        compiler_params=pltpu.CompilerParams(
            dimension_semantics=("parallel",),
            vmem_limit_bytes=32 * 1024 * 1024,
        ),
    )(x_p, wd_p, bd_p, wh_p, bh_p, wt_p, bt_p, wl_p, bl_p)

    return out_p[:B, :out_size]


def init_params(key, in_dims, input_size, output_size, num_layers,
                gate_bias=-1.0):
    """Deterministic synthetic parameter init (shapes match the nn.Module)."""
    ks = jax.random.split(key, 5)
    scale = 0.1
    # dimChange: Linear(inDims, input_size)
    wd = scale * jax.random.normal(ks[0], (in_dims, input_size), jnp.float32)
    bd = jnp.zeros((1, input_size), jnp.float32)
    # highway layers: transform (Wh, bh) and gate (Wt, bt), stacked over layers
    wh = scale * jax.random.normal(ks[1], (num_layers, input_size, input_size),
                                   jnp.float32)
    bh = jnp.zeros((num_layers, 1, input_size), jnp.float32)
    wt = scale * jax.random.normal(ks[2], (num_layers, input_size, input_size),
                                   jnp.float32)
    bt = jnp.full((num_layers, 1, input_size), gate_bias, jnp.float32)
    # final linear: Linear(input_size, output_size)
    wl = scale * jax.random.normal(ks[3], (input_size, output_size), jnp.float32)
    bl = jnp.zeros((1, output_size), jnp.float32)
    return (wd, bd, wh, bh, wt, bt, wl, bl)


def reference_forward(x, params, num_layers):
    """Pure-JAX f32 reference for correctness checking."""
    wd, bd, wh, bh, wt, bt, wl, bl = params
    h = jax.nn.relu(x @ wd + bd)
    for l in range(num_layers):
        plain = jax.nn.relu(h @ wh[l] + bh[l])
        gate = jax.nn.sigmoid(h @ wt[l] + bt[l])
        h = gate * plain + (1.0 - gate) * h
    return jax.nn.softmax(h @ wl + bl, axis=-1)


if __name__ == "__main__":
    # Small shapes consistent with the module's forward:
    #   x: (batch, inDims) -> relu(dimChange) -> (batch, input_size)
    #   -> numLayers highway layers -> softmax(linear) -> (batch, output_size)
    batch = 8
    in_dims = 32
    input_size = 64
    output_size = 16
    num_layers = 2

    key = jax.random.PRNGKey(0)
    kx, kp = jax.random.split(key)
    x = jax.random.normal(kx, (batch, in_dims), jnp.float32)
    params = init_params(kp, in_dims, input_size, output_size, num_layers)

    out = highway_fc_model(x, params, num_layers=num_layers)
    out = jax.block_until_ready(out)

    ref = reference_forward(x, params, num_layers)
    assert out.shape == (batch, output_size)
    # softmax rows sum to 1 (approx-reciprocal normalization -> loose atol)
    assert jnp.allclose(jnp.sum(out, axis=-1), 1.0, atol=5e-3)
    # bf16 matmul operands with f32 accumulation -> loosened tolerance
    assert jnp.allclose(out, ref, atol=2e-2, rtol=2e-2)

    print("KERNEL_OK")
</pallas_src>

<mosaic_0001>
module attributes {stable_mosaic.version = 11 : i64} {
  func.func @highway_fc_kernel(%arg0: i32, %arg1: memref<128x128xf32, #tpu.memory_space<vmem>>, %arg2: memref<128x128xbf16, #tpu.memory_space<vmem>>, %arg3: memref<1x128xf32, #tpu.memory_space<vmem>>, %arg4: memref<2x128x128xbf16, #tpu.memory_space<vmem>>, %arg5: memref<2x1x128xf32, #tpu.memory_space<vmem>>, %arg6: memref<2x128x128xbf16, #tpu.memory_space<vmem>>, %arg7: memref<2x1x128xf32, #tpu.memory_space<vmem>>, %arg8: memref<128x128xbf16, #tpu.memory_space<vmem>>, %arg9: memref<1x128xf32, #tpu.memory_space<vmem>>, %arg10: memref<128x128xf32, #tpu.memory_space<vmem>>) attributes {dimension_semantics = [#tpu.dimension_semantics<parallel>], iteration_bounds = array<i64: 1>, scalar_prefetch = 0 : i64, scratch_operands = 0 : i64, tpu.core_type = #tpu.core_type<tc>, window_params = [{transform_indices = @transform_0, window_bounds = array<i64: 128, 128>}, {pipeline_mode = #tpu.pipeline_mode<synchronous>, transform_indices = @transform_1, window_bounds = array<i64: 128, 128>}, {pipeline_mode = #tpu.pipeline_mode<synchronous>, transform_indices = @transform_2, window_bounds = array<i64: 1, 128>}, {pipeline_mode = #tpu.pipeline_mode<synchronous>, transform_indices = @transform_3, window_bounds = array<i64: 2, 128, 128>}, {pipeline_mode = #tpu.pipeline_mode<synchronous>, transform_indices = @transform_4, window_bounds = array<i64: 2, 1, 128>}, {pipeline_mode = #tpu.pipeline_mode<synchronous>, transform_indices = @transform_5, window_bounds = array<i64: 2, 128, 128>}, {pipeline_mode = #tpu.pipeline_mode<synchronous>, transform_indices = @transform_6, window_bounds = array<i64: 2, 1, 128>}, {pipeline_mode = #tpu.pipeline_mode<synchronous>, transform_indices = @transform_7, window_bounds = array<i64: 128, 128>}, {pipeline_mode = #tpu.pipeline_mode<synchronous>, transform_indices = @transform_8, window_bounds = array<i64: 1, 128>}, {transform_indices = @transform_9, window_bounds = array<i64: 128, 128>}]} {
    %c0 = arith.constant 0 : index
    %c0_0 = arith.constant 0 : index
    %0 = vector.load %arg1[%c0, %c0_0] : memref<128x128xf32, #tpu.memory_space<vmem>>, vector<128x128xf32>
    %1 = arith.truncf %0 : vector<128x128xf32> to vector<128x128xbf16>
    %c0_1 = arith.constant 0 : index
    %c0_2 = arith.constant 0 : index
    %2 = vector.load %arg2[%c0_1, %c0_2] : memref<128x128xbf16, #tpu.memory_space<vmem>>, vector<128x128xbf16>
    %cst = arith.constant dense<0.000000e+00> : vector<128x128xf32>
    %3 = tpu.matmul %1, %2, %cst {dimension_numbers = #tpu.dot_dimension_numbers<[1], [0], [0], [1], [0, 0, 1, 1], [], []>} : vector<128x128xbf16>, vector<128x128xbf16>, vector<128x128xf32> -> vector<128x128xf32>
    %c0_3 = arith.constant 0 : index
    %c0_4 = arith.constant 0 : index
    %4 = vector.load %arg3[%c0_3, %c0_4] : memref<1x128xf32, #tpu.memory_space<vmem>>, vector<1x128xf32>
    %5 = vector.broadcast %4 : vector<1x128xf32> to vector<128x128xf32>
    %6 = arith.addf %3, %5 : vector<128x128xf32>
    %cst_5 = arith.constant 0.000000e+00 : f32
    %7 = vector.broadcast %cst_5 : f32 to vector<128x128xf32>
    %8 = arith.maximumf %6, %7 : vector<128x128xf32>
    %9 = arith.truncf %8 : vector<128x128xf32> to vector<128x128xbf16>
    %c0_6 = arith.constant 0 : index
    %c0_7 = arith.constant 0 : index
    %c0_8 = arith.constant 0 : index
    %10 = vector.load %arg4[%c0_6, %c0_7, %c0_8] : memref<2x128x128xbf16, #tpu.memory_space<vmem>>, vector<1x128x128xbf16>
    %11 = vector.shape_cast %10 : vector<1x128x128xbf16> to vector<128x128xbf16>
    %cst_9 = arith.constant dense<0.000000e+00> : vector<128x128xf32>
    %12 = tpu.matmul %9, %11, %cst_9 {dimension_numbers = #tpu.dot_dimension_numbers<[1], [0], [0], [1], [0, 0, 1, 1], [], []>} : vector<128x128xbf16>, vector<128x128xbf16>, vector<128x128xf32> -> vector<128x128xf32>
    %c0_10 = arith.constant 0 : index
    %c0_11 = arith.constant 0 : index
    %c0_12 = arith.constant 0 : index
    %13 = vector.load %arg5[%c0_10, %c0_11, %c0_12] : memref<2x1x128xf32, #tpu.memory_space<vmem>>, vector<1x1x128xf32>
    %14 = vector.shape_cast %13 : vector<1x1x128xf32> to vector<1x128xf32>
    %15 = vector.broadcast %14 : vector<1x128xf32> to vector<128x128xf32>
    %16 = arith.addf %12, %15 : vector<128x128xf32>
    %cst_13 = arith.constant 0.000000e+00 : f32
    %17 = vector.broadcast %cst_13 : f32 to vector<128x128xf32>
    %18 = arith.maximumf %16, %17 : vector<128x128xf32>
    %c0_14 = arith.constant 0 : index
    %c0_15 = arith.constant 0 : index
    %c0_16 = arith.constant 0 : index
    %19 = vector.load %arg6[%c0_14, %c0_15, %c0_16] : memref<2x128x128xbf16, #tpu.memory_space<vmem>>, vector<1x128x128xbf16>
    %20 = vector.shape_cast %19 : vector<1x128x128xbf16> to vector<128x128xbf16>
    %cst_17 = arith.constant dense<0.000000e+00> : vector<128x128xf32>
    %21 = tpu.matmul %9, %20, %cst_17 {dimension_numbers = #tpu.dot_dimension_numbers<[1], [0], [0], [1], [0, 0, 1, 1], [], []>} : vector<128x128xbf16>, vector<128x128xbf16>, vector<128x128xf32> -> vector<128x128xf32>
    %c0_18 = arith.constant 0 : index
    %c0_19 = arith.constant 0 : index
    %c0_20 = arith.constant 0 : index
    %22 = vector.load %arg7[%c0_18, %c0_19, %c0_20] : memref<2x1x128xf32, #tpu.memory_space<vmem>>, vector<1x1x128xf32>
    %23 = vector.shape_cast %22 : vector<1x1x128xf32> to vector<1x128xf32>
    %24 = vector.broadcast %23 : vector<1x128xf32> to vector<128x128xf32>
    %25 = arith.addf %21, %24 : vector<128x128xf32>
    %26 = arith.negf %25 : vector<128x128xf32>
    %27 = math.exp %26 : vector<128x128xf32>
    %cst_21 = arith.constant 1.000000e+00 : f32
    %28 = vector.broadcast %cst_21 : f32 to vector<128x128xf32>
    %29 = arith.addf %28, %27 : vector<128x128xf32>
    %30 = arith.divf %28, %29 : vector<128x128xf32>
    %31 = arith.mulf %30, %18 : vector<128x128xf32>
    %cst_22 = arith.constant 1.000000e+00 : f32
    %32 = vector.broadcast %cst_22 : f32 to vector<128x128xf32>
    %33 = arith.subf %32, %30 : vector<128x128xf32>
    %34 = arith.mulf %33, %8 : vector<128x128xf32>
    %35 = arith.addf %31, %34 : vector<128x128xf32>
    %36 = arith.truncf %35 : vector<128x128xf32> to vector<128x128xbf16>
    %c1 = arith.constant 1 : index
    %c0_23 = arith.constant 0 : index
    %c0_24 = arith.constant 0 : index
    %37 = vector.load %arg4[%c1, %c0_23, %c0_24] : memref<2x128x128xbf16, #tpu.memory_space<vmem>>, vector<1x128x128xbf16>
    %38 = vector.shape_cast %37 : vector<1x128x128xbf16> to vector<128x128xbf16>
    %cst_25 = arith.constant dense<0.000000e+00> : vector<128x128xf32>
    %39 = tpu.matmul %36, %38, %cst_25 {dimension_numbers = #tpu.dot_dimension_numbers<[1], [0], [0], [1], [0, 0, 1, 1], [], []>} : vector<128x128xbf16>, vector<128x128xbf16>, vector<128x128xf32> -> vector<128x128xf32>
    %c1_26 = arith.constant 1 : index
    %c0_27 = arith.constant 0 : index
    %c0_28 = arith.constant 0 : index
    %40 = vector.load %arg5[%c1_26, %c0_27, %c0_28] : memref<2x1x128xf32, #tpu.memory_space<vmem>>, vector<1x1x128xf32>
    %41 = vector.shape_cast %40 : vector<1x1x128xf32> to vector<1x128xf32>
    %42 = vector.broadcast %41 : vector<1x128xf32> to vector<128x128xf32>
    %43 = arith.addf %39, %42 : vector<128x128xf32>
    %cst_29 = arith.constant 0.000000e+00 : f32
    %44 = vector.broadcast %cst_29 : f32 to vector<128x128xf32>
    %45 = arith.maximumf %43, %44 : vector<128x128xf32>
    %c1_30 = arith.constant 1 : index
    %c0_31 = arith.constant 0 : index
    %c0_32 = arith.constant 0 : index
    %46 = vector.load %arg6[%c1_30, %c0_31, %c0_32] : memref<2x128x128xbf16, #tpu.memory_space<vmem>>, vector<1x128x128xbf16>
    %47 = vector.shape_cast %46 : vector<1x128x128xbf16> to vector<128x128xbf16>
    %cst_33 = arith.constant dense<0.000000e+00> : vector<128x128xf32>
    %48 = tpu.matmul %36, %47, %cst_33 {dimension_numbers = #tpu.dot_dimension_numbers<[1], [0], [0], [1], [0, 0, 1, 1], [], []>} : vector<128x128xbf16>, vector<128x128xbf16>, vector<128x128xf32> -> vector<128x128xf32>
    %c1_34 = arith.constant 1 : index
    %c0_35 = arith.constant 0 : index
    %c0_36 = arith.constant 0 : index
    %49 = vector.load %arg7[%c1_34, %c0_35, %c0_36] : memref<2x1x128xf32, #tpu.memory_space<vmem>>, vector<1x1x128xf32>
    %50 = vector.shape_cast %49 : vector<1x1x128xf32> to vector<1x128xf32>
    %51 = vector.broadcast %50 : vector<1x128xf32> to vector<128x128xf32>
    %52 = arith.addf %48, %51 : vector<128x128xf32>
    %53 = arith.negf %52 : vector<128x128xf32>
    %54 = math.exp %53 : vector<128x128xf32>
    %cst_37 = arith.constant 1.000000e+00 : f32
    %55 = vector.broadcast %cst_37 : f32 to vector<128x128xf32>
    %56 = arith.addf %55, %54 : vector<128x128xf32>
    %57 = arith.divf %55, %56 : vector<128x128xf32>
    %58 = arith.mulf %57, %45 : vector<128x128xf32>
    %cst_38 = arith.constant 1.000000e+00 : f32
    %59 = vector.broadcast %cst_38 : f32 to vector<128x128xf32>
    %60 = arith.subf %59, %57 : vector<128x128xf32>
    %61 = arith.mulf %60, %35 : vector<128x128xf32>
    %62 = arith.addf %58, %61 : vector<128x128xf32>
    %63 = arith.truncf %62 : vector<128x128xf32> to vector<128x128xbf16>
    %c0_39 = arith.constant 0 : index
    %c0_40 = arith.constant 0 : index
    %64 = vector.load %arg8[%c0_39, %c0_40] : memref<128x128xbf16, #tpu.memory_space<vmem>>, vector<128x128xbf16>
    %cst_41 = arith.constant dense<0.000000e+00> : vector<128x128xf32>
    %65 = tpu.matmul %63, %64, %cst_41 {dimension_numbers = #tpu.dot_dimension_numbers<[1], [0], [0], [1], [0, 0, 1, 1], [], []>} : vector<128x128xbf16>, vector<128x128xbf16>, vector<128x128xf32> -> vector<128x128xf32>
    %c0_42 = arith.constant 0 : index
    %c0_43 = arith.constant 0 : index
    %66 = vector.load %arg9[%c0_42, %c0_43] : memref<1x128xf32, #tpu.memory_space<vmem>>, vector<1x128xf32>
    %67 = vector.broadcast %66 : vector<1x128xf32> to vector<128x128xf32>
    %68 = arith.addf %65, %67 : vector<128x128xf32>
    %cst_44 = arith.constant dense<0xFF800000> : vector<128xf32>
    %69 = vector.multi_reduction <maximumf>, %68, %cst_44 [1] : vector<128x128xf32> to vector<128xf32>
    %70 = vector.shape_cast %69 : vector<128xf32> to vector<128x1xf32>
    %71 = vector.broadcast %70 : vector<128x1xf32> to vector<128x128xf32>
    %72 = arith.subf %68, %71 : vector<128x128xf32>
    %73 = math.exp %72 : vector<128x128xf32>
    %cst_45 = arith.constant dense<0.000000e+00> : vector<128xf32>
    %74 = vector.multi_reduction <add>, %73, %cst_45 [1] : vector<128x128xf32> to vector<128xf32>
    %75 = vector.shape_cast %74 : vector<128xf32> to vector<128x1xf32>
    %76 = tpu.reciprocal %75 {approx = true} : vector<128x1xf32> -> vector<128x1xf32>
    %77 = vector.broadcast %76 : vector<128x1xf32> to vector<128x128xf32>
    %78 = arith.mulf %73, %77 : vector<128x128xf32>
    %c0_46 = arith.constant 0 : index
    %c0_47 = arith.constant 0 : index
    %79 = vector.load %arg10[%c0_46, %c0_47] : memref<128x128xf32, #tpu.memory_space<vmem>>, vector<128x128xf32>
    tpu.vector_store %arg10[%c0_46, %c0_47], %78 {strides = array<i32>} : memref<128x128xf32, #tpu.memory_space<vmem>>, vector<128x128xf32>,
    return
  }
  func.func @transform_0(%arg0: i32) -> (i32, i32) {
    %c0_i32 = arith.constant 0 : i32
    %c0_i32_0 = arith.constant 0 : i32
    return %arg0, %c0_i32 : i32, i32
  }
  func.func @transform_1(%arg0: i32) -> (i32, i32) {
    %c0_i32 = arith.constant 0 : i32
    %c0_i32_0 = arith.constant 0 : i32
    %c0_i32_1 = arith.constant 0 : i32
    return %c0_i32, %c0_i32_0 : i32, i32
  }
  func.func @transform_2(%arg0: i32) -> (i32, i32) {
    %c0_i32 = arith.constant 0 : i32
    %c0_i32_0 = arith.constant 0 : i32
    %c0_i32_1 = arith.constant 0 : i32
    return %c0_i32, %c0_i32_0 : i32, i32
  }
  func.func @transform_3(%arg0: i32) -> (i32, i32, i32) {
    %c0_i32 = arith.constant 0 : i32
    %c0_i32_0 = arith.constant 0 : i32
    %c0_i32_1 = arith.constant 0 : i32
    %c0_i32_2 = arith.constant 0 : i32
    return %c0_i32, %c0_i32_0, %c0_i32_1 : i32, i32, i32
  }
  func.func @transform_4(%arg0: i32) -> (i32, i32, i32) {
    %c0_i32 = arith.constant 0 : i32
    %c0_i32_0 = arith.constant 0 : i32
    %c0_i32_1 = arith.constant 0 : i32
    %c0_i32_2 = arith.constant 0 : i32
    return %c0_i32, %c0_i32_0, %c0_i32_1 : i32, i32, i32
  }
  func.func @transform_5(%arg0: i32) -> (i32, i32, i32) {
    %c0_i32 = arith.constant 0 : i32
    %c0_i32_0 = arith.constant 0 : i32
    %c0_i32_1 = arith.constant 0 : i32
    %c0_i32_2 = arith.constant 0 : i32
    return %c0_i32, %c0_i32_0, %c0_i32_1 : i32, i32, i32
  }
  func.func @transform_6(%arg0: i32) -> (i32, i32, i32) {
    %c0_i32 = arith.constant 0 : i32
    %c0_i32_0 = arith.constant 0 : i32
    %c0_i32_1 = arith.constant 0 : i32
    %c0_i32_2 = arith.constant 0 : i32
    return %c0_i32, %c0_i32_0, %c0_i32_1 : i32, i32, i32
  }
  func.func @transform_7(%arg0: i32) -> (i32, i32) {
    %c0_i32 = arith.constant 0 : i32
    %c0_i32_0 = arith.constant 0 : i32
    %c0_i32_1 = arith.constant 0 : i32
    return %c0_i32, %c0_i32_0 : i32, i32
  }
  func.func @transform_8(%arg0: i32) -> (i32, i32) {
    %c0_i32 = arith.constant 0 : i32
    %c0_i32_0 = arith.constant 0 : i32
    %c0_i32_1 = arith.constant 0 : i32
    return %c0_i32, %c0_i32_0 : i32, i32
  }
  func.func @transform_9(%arg0: i32) -> (i32, i32) {
    %c0_i32 = arith.constant 0 : i32
    %c0_i32_0 = arith.constant 0 : i32
    return %arg0, %c0_i32 : i32, i32
  }
}

</mosaic_0001>

<bundles_post_ra>
// kernel: tpu_custom_call.1
= control target key start
LH: loop header
LB: loop body
LE: loop exit
PB: predicated region body
PF: predicated region fallthrough
CT: control target
= control target key end

     0   :  { %14 = vsyncpa [#allocation3], 0  ;;  %s3193_s0 = inlined_call_operand.hbm [shape: f32[128,128], index: 0, kind: input, shape index: {}]   ;;  %s3194_s1 = inlined_call_operand.hbm [shape: bf16[128,128], index: 1, kind: input, shape index: {}]   ;;  %s3195_s2 = inlined_call_operand.hbm [shape: f32[1,128], index: 2, kind: input, shape index: {}]   ;;  %s3196_s3 = inlined_call_operand.hbm [shape: bf16[2,128,128], index: 3, kind: input, shape index: {}]   ;;  %s3197_s4 = inlined_call_operand.vmem [shape: f32[2,1,128], index: 4, kind: input, shape index: {}]   ;;  %s3198_s5 = inlined_call_operand.hbm [shape: bf16[2,128,128], index: 5, kind: input, shape index: {}]   ;;  %s3199_s6 = inlined_call_operand.vmem [shape: f32[2,1,128], index: 6, kind: input, shape index: {}]   ;;  %s3200_s7 = inlined_call_operand.hbm [shape: bf16[128,128], index: 7, kind: input, shape index: {}]   ;;  %s3201_s8 = inlined_call_operand.vmem [shape: f32[1,128], index: 8, kind: input, shape index: {}]   ;;  %s3202_s9 = inlined_call_operand.hbm [shape: f32[128,128], index: 9, kind: output, shape index: {}]  }
   0x1   :  { %15 = vsyncpa [#allocation6], 0 }
   0x2   :  { %16 = vsyncpa [#allocation9], 0 }
   0x3   :  { %17 = vsyncpa [#allocation12], 0  ;;  %s36_s11 = sshll.u32 %s3194_s1, 4  ;;  %s37_s11 = int_to_ptr.hbm [resolvable:$true] %s36_s11 }
   0x4   :  { %18 = vsyncpa [#allocation4], 0  ;;  %s2522_s12 = smov [#allocation5]   ;;  %s60_s16 = sshll.u32 %s3196_s3, 4  ;;  %s61_s16 = int_to_ptr.hbm [resolvable:$true] %s60_s16 }
   0x5   :  { %s38_s13 = sshll.u32 %s2522_s12, 4  ;;  %s2523_s17 = smov 64   ;;  %s39_s13 = int_to_ptr.vmem [resolvable:$true] %s38_s13 }
   0x6   :  { %s2524_s18 = smov 4   ;;  %s2525_s19 = smov [#allocation8]  }
   0x7   :  { %44 = dma.hbm_to_vmem [thread:$0]  %s37_s11, 1024, %s39_s13, [#allocation6], %s2523_s17, %s2523_s17, %s2524_s18  }
   0x8   :  { %s62_s20 = sshll.u32 %s2525_s19, 4  ;;  %s23_s22 = sshll.u32 %s3193_s0, 4  ;;  %s63_s20 = int_to_ptr.vmem [resolvable:$true] %s62_s20  ;;  %s24_s22 = int_to_ptr.hbm [resolvable:$true] %s23_s22 }
   0x9   :  { %68 = dma.hbm_to_vmem [thread:$0]  %s61_s16, 2048, %s63_s20, [#allocation9], %s2523_s17, %s2523_s17, %s2524_s18  }
   0xa   :  { %s2526_s3 = smov [#allocation2]   ;;  %s50_s26 = sshll.u32 %s3195_s2, 4  ;;  %s51_s26 = int_to_ptr.hbm [resolvable:$true] %s50_s26 }
   0xb   :  { %s25_s23 = sshll.u32 %s2526_s3, 4  ;;  %s2527_s27 = smov 128   ;;  %s26_s23 = int_to_ptr.vmem [resolvable:$true] %s25_s23 }
   0xc   :  { %s2528_s28 = smov 8   ;;  %s2529_s0 = smov [#allocation7]  }
   0xd   :  { %31 = dma.hbm_to_vmem [thread:$0]  %s24_s22, 2048, %s26_s23, [#allocation3], %s2527_s27, %s2527_s27, %s2528_s28  }
   0xe   :  { %s52_s29 = sshll.u32 %s2529_s0, 4  ;;  %s75_s11 = sshll.u32 %s3198_s5, 4  ;;  %s53_s29 = int_to_ptr.vmem [resolvable:$true] %s52_s29  ;;  %s76_s11 = int_to_ptr.hbm [resolvable:$true] %s75_s11 }
   0xf   :  { %55 = dma.hbm_to_vmem [thread:$0]  %s51_s26, 16, %s53_s29, [#allocation6]  }
  0x10   :  { %s90_s2 = sshll.u32 %s3200_s7, 4  ;;  %s2530_s14 = smov [#allocation10]   ;;  %s91_s2 = int_to_ptr.hbm [resolvable:$true] %s90_s2 }
  0x11   :  { %s77_s15 = sshll.u32 %s2530_s14, 4  ;;  %s2531_s16 = smov [#allocation11]   ;;  %s78_s15 = int_to_ptr.vmem [resolvable:$true] %s77_s15 }
  0x12   :  { %83 = dma.hbm_to_vmem [thread:$0]  %s76_s11, 2048, %s78_s15, [#allocation9], %s2523_s17, %s2523_s17, %s2524_s18  }
  0x13   :  { %s92_s19 = sshll.u32 %s2531_s16, 4  ;;  %s93_s19 = int_to_ptr.vmem [resolvable:$true] %s92_s19 }
  0x14   :  { %98 = dma.hbm_to_vmem [thread:$0]  %s91_s2, 1024, %s93_s19, [#allocation12], %s2523_s17, %s2523_s17, %s2524_s18  }
  0x15   :  { %2512 = dma.done.wait [#allocation3], 2048  }
  0x16   :  { %2513 = vsyncadd [#allocation3], 4294965248 }
  0x17   :  { %2514 = dma.done.wait [#allocation6], 1040  }
  0x18   :  { %2515 = vsyncadd [#allocation6], 4294966256 }
  0x19   :  { %2516 = dma.done.wait [#allocation9], 4096  }
  0x1a   :  { %2517 = vsyncadd [#allocation9], 4294963200 }
  0x1b   :  { %2518 = dma.done.wait [#allocation12], 1024  }
  0x1c   :  { %2519 = vsyncadd [#allocation12], 4294966272  ;;  %v2078_v0 = vld [vmem:[#allocation5 + $0x38] sm:$0xff]  ;;  %v2077_v1 = vld [vmem:[#allocation5 + $0x30] sm:$0xff]  ;;  %s1829_s25 = sshll.u32 %s3202_s9, 4  ;;  %s1830_s25 = int_to_ptr.hbm [resolvable:$true] %s1829_s25 }
  0x1d   :  { %217 = vmatpush.bf16.msra.mxu0 %v2078_v0  ;;  %2119 = vmatpush.bf16.msra.mxu2 %v2078_v0  ;;  %v2076_v2 = vld [vmem:[#allocation5 + $0x28] sm:$0xff]  ;;  %v2075_v3 = vld [vmem:[#allocation5 + $0x20] sm:$0xff]  ;;  %v2074_v4 = vld [vmem:[#allocation5 + $0x18] sm:$0xff] }
  0x1e   :  { %v2073_v5 = vld [vmem:[#allocation5 + $0x10] sm:$0xff]  ;;  %v2072_v6 = vld [vmem:[#allocation5 + $0x8] sm:$0xff]  ;;  %v2071_v7 = vld [vmem:[#allocation5] sm:$0xff] }
  0x1f   :  { %v125_v8 = vld [vmem:[#allocation2] sm:$0xff]  ;;  %v126_v9 = vld [vmem:[#allocation2 + $0x8] sm:$0xff]  ;;  %v127_v14 = vld [vmem:[#allocation2 + $0x10] sm:$0xff] }
  0x20   :  { %v141_v10 = vpack.c.bf16 %v126_v9, %v125_v8  ;;  %v133_v11 = vld [vmem:[#allocation2 + $0x40] sm:$0xff]  ;;  %v134_v12 = vld [vmem:[#allocation2 + $0x48] sm:$0xff]  ;;  %v128_v15 = vld [vmem:[#allocation2 + $0x18] sm:$0xff] }
  0x21   :  { %218 = vmatpush.bf16.msra.mxu0 %v2077_v1  ;;  %2120 = vmatpush.bf16.msra.mxu2 %v2077_v1  ;;  %v145_v13 = vpack.c.bf16 %v134_v12, %v133_v11  ;;  %v142_v16 = vpack.c.bf16 %v128_v15, %v127_v14  ;;  %v135_v17 = vld [vmem:[#allocation2 + $0x50] sm:$0xff]  ;;  %v136_v18 = vld [vmem:[#allocation2 + $0x58] sm:$0xff]  ;;  %v129_v25 = vld [vmem:[#allocation2 + $0x20] sm:$0xff] }
  0x22   :  { %v146_v19 = vpack.c.bf16 %v136_v18, %v135_v17  ;;  %v2094_v20 = vld [vmem:[#allocation10 + $0x38] sm:$0xff]  ;;  %v2093_v21 = vld [vmem:[#allocation10 + $0x30] sm:$0xff]  ;;  %v2092_v24 = vld [vmem:[#allocation10 + $0x28] sm:$0xff] }
  0x23   :  { %v2086_v22 = vld [vmem:[#allocation8 + $0x38] sm:$0xff]  ;;  %v2085_v23 = vld [vmem:[#allocation8 + $0x30] sm:$0xff]  ;;  %v130_v26 = vld [vmem:[#allocation2 + $0x28] sm:$0xff] }
  0x24   :  { %358 = vmatpush.bf16.msra.mxu1 %v2086_v22  ;;  %2127 = vmatpush.bf16.msra.mxu3 %v2086_v22  ;;  %v2084_v27 = vld [vmem:[#allocation8 + $0x28] sm:$0xff]  ;;  %v143_v28 = vpack.c.bf16 %v130_v26, %v129_v25  ;;  %v137_v29 = vld [vmem:[#allocation2 + $0x60] sm:$0xff]  ;;  %v2089_v35 = vld [vmem:[#allocation10 + $0x10] sm:$0xff] }
  0x25   :  { %219 = vmatpush.bf16.msra.mxu0 %v2076_v2  ;;  %2121 = vmatpush.bf16.msra.mxu2 %v2076_v2  ;;  %v138_v30 = vld [vmem:[#allocation2 + $0x68] sm:$0xff]  ;;  %v2090_v34 = vld [vmem:[#allocation10 + $0x18] sm:$0xff]  ;;  %v131_v37 = vld [vmem:[#allocation2 + $0x30] sm:$0xff] }
  0x26   :  { %v2091_v31 = vld [vmem:[#allocation10 + $0x20] sm:$0xff]  ;;  %v147_v33 = vpack.c.bf16 %v138_v30, %v137_v29  ;;  %v2088_v36 = vld [vmem:[#allocation10 + $0x8] sm:$0xff]  ;;  %v132_v38 = vld [vmem:[#allocation2 + $0x38] sm:$0xff] }
  0x27   :  { %v2083_v32 = vld [vmem:[#allocation8 + $0x20] sm:$0xff]  ;;  %v144_v39 = vpack.c.bf16 %v132_v38, %v131_v37  ;;  %v139_v40 = vld [vmem:[#allocation2 + $0x70] sm:$0xff]  ;;  %v140_v41 = vld [vmem:[#allocation2 + $0x78] sm:$0xff] }
  0x28   :  { %359 = vmatpush.bf16.msra.mxu1 %v2085_v23  ;;  %2128 = vmatpush.bf16.msra.mxu3 %v2085_v23  ;;  %v148_v42 = vpack.c.bf16 %v140_v41, %v139_v40  ;;  %v2082_v43 = vld [vmem:[#allocation8 + $0x18] sm:$0xff]  ;;  %v2081_v44 = vld [vmem:[#allocation8 + $0x10] sm:$0xff]  ;;  %v2087_v45 = vld [vmem:[#allocation10] sm:$0xff] }
  0x29   :  { %220 = vmatpush.bf16.msra.mxu0 %v2075_v3  ;;  %2122 = vmatpush.bf16.msra.mxu2 %v2075_v3  ;;  %v2080_v46 = vld [vmem:[#allocation8 + $0x8] sm:$0xff]  ;;  %v2079_v47 = vld [vmem:[#allocation8] sm:$0xff]  ;;  %v2616_v49 = vld [vmem:[#allocation7] ss:$0 sm:$0xff] }
  0x2a   :  { %v2110_v41 = vld [vmem:[#allocation10 + $0x78] sm:$0xff] }
  0x2c   :  { %360 = vmatpush.bf16.msra.mxu1 %v2084_v27  ;;  %2129 = vmatpush.bf16.msra.mxu3 %v2084_v27 }
  0x2d   :  { %221 = vmatpush.bf16.msra.mxu0 %v2074_v4  ;;  %2123 = vmatpush.bf16.msra.mxu2 %v2074_v4 }
  0x30   :  { %361 = vmatpush.bf16.msra.mxu1 %v2083_v32  ;;  %2130 = vmatpush.bf16.msra.mxu3 %v2083_v32 }
  0x31   :  { %222 = vmatpush.bf16.msra.mxu0 %v2073_v5  ;;  %2124 = vmatpush.bf16.msra.mxu2 %v2073_v5 }
  0x34   :  { %362 = vmatpush.bf16.msra.mxu1 %v2082_v43  ;;  %2131 = vmatpush.bf16.msra.mxu3 %v2082_v43  ;;  %v2108_v43 = vld [vmem:[#allocation10 + $0x68] sm:$0xff] }
  0x35   :  { %223 = vmatpush.bf16.msra.mxu0 %v2072_v6  ;;  %2125 = vmatpush.bf16.msra.mxu2 %v2072_v6 }
  0x38   :  { %363 = vmatpush.bf16.msra.mxu1 %v2081_v44  ;;  %2132 = vmatpush.bf16.msra.mxu3 %v2081_v44  ;;  %v2102_v44 = vld [vmem:[#allocation8 + $0x78] sm:$0xff] }
  0x39   :  { %224 = vmatpush.bf16.msra.mxu0 %v2071_v7  ;;  %2126 = vmatpush.bf16.msra.mxu2 %v2071_v7 }
  0x3c   :  { %225 = vmatmul.bf16.vlgmr.msra.gmra.mxu0 %v141_v10  ;;  %245 = vmatmul.bf16.vlgmr.msra.gmra.mxu2 %v145_v13 }
  0x3d   :  { %491 = vmatpush.bf16.msrb.mxu2 %v2094_v20  ;;  %364 = vmatpush.bf16.msra.mxu1 %v2080_v46 }
  0x3e   :  { %2133 = vmatpush.bf16.msra.mxu3 %v2080_v46  ;;  %1121 = vmatpush.bf16.msrb.mxu0 %v2110_v41  ;;  %v2100_v46 = vld [vmem:[#allocation8 + $0x68] sm:$0xff] }
  0x41   :  { %492 = vmatpush.bf16.msrb.mxu2 %v2093_v21  ;;  %365 = vmatpush.bf16.msra.mxu1 %v2079_v47 }
  0x42   :  { %2134 = vmatpush.bf16.msra.mxu3 %v2079_v47  ;;  %v2107_v47 = vld [vmem:[#allocation10 + $0x60] sm:$0xff] }
  0x45   :  { %493 = vmatpush.bf16.msrb.mxu2 %v2092_v24 }
  0x46   :  { %986 = vmatpush.bf16.msrb.mxu3 %v2102_v44 }
  0x49   :  { %494 = vmatpush.bf16.msrb.mxu2 %v2091_v31 }
  0x4c   :  { %230 = vmatmul.bf16.gmra.mxu0 %v142_v16  ;;  %250 = vmatmul.bf16.gmra.mxu2 %v146_v19 }
  0x4d   :  { %495 = vmatpush.bf16.msrb.mxu2 %v2090_v34 }
  0x51   :  { %496 = vmatpush.bf16.msrb.mxu2 %v2089_v35 }
  0x55   :  { %497 = vmatpush.bf16.msrb.mxu2 %v2088_v36 }
  0x59   :  { %498 = vmatpush.bf16.msrb.mxu2 %v2087_v45  ;;  %v2101_v45 = vld [vmem:[#allocation8 + $0x70] sm:$0xff] }
  0x5a   :  { %987 = vmatpush.bf16.msrb.mxu3 %v2101_v45 }
  0x5c   :  { %235 = vmatmul.bf16.gmra.mxu0 %v143_v28  ;;  %255 = vmatmul.bf16.gmra.mxu2 %v147_v33 }
  0x5e   :  { %988 = vmatpush.bf16.msrb.mxu3 %v2100_v46 }
  0x6c   :  { %240 = vmatmul.bf16.gmra.mxu0 %v144_v39  ;;  %260 = vmatmul.bf16.gmra.mxu2 %v148_v42  ;;  %v2109_v42 = vld [vmem:[#allocation10 + $0x70] sm:$0xff] }
  0x6d   :  { %1122 = vmatpush.bf16.msrb.mxu0 %v2109_v42 }
  0x71   :  { %1123 = vmatpush.bf16.msrb.mxu0 %v2108_v43 }
  0x75   :  { %1124 = vmatpush.bf16.msrb.mxu0 %v2107_v47 }
  0xb9   :  { %v226_v48 = vpop.f32.mrf.mxu0 }
  0xba   :  { %v2619_v50 = vadd.f32 %v2616_v49, %v226_v48  ;;  %v2099_v48 = vld [vmem:[#allocation8 + $0x60] sm:$0xff] }
  0xbb   :  { %989 = vmatpush.bf16.msrb.mxu3 %v2099_v48 }
  0xbc   :  { %v266_v53 = vmax.f32 %v2619_v50, 0.0 }
  0xbf   :  { %v246_v57 = vpop.f32.mrf.mxu2 }
  0xc0   :  { %v2631_v58 = vadd.f32 %v2616_v49, %v246_v57 }
  0xc1   :  { %v228_v51 = vpop.f32.mrf.mxu0 }
  0xc2   :  { %v2622_v52 = vadd.f32 %v2616_v49, %v228_v51  ;;  %v274_v63 = vmax.f32 %v2631_v58, 0.0  ;;  %v2106_v51 = vld [vmem:[#allocation10 + $0x58] sm:$0xff] }
  0xc3   :  { %1125 = vmatpush.bf16.msrb.mxu0 %v2106_v51 }
  0xc4   :  { %v267_v54 = vmax.f32 %v2622_v52, 0.0 }
  0xc6   :  { %v282_v55 = vpack.c.bf16 %v267_v54, %v266_v53 }
  0xc7   :  { %v248_v61 = vpop.f32.mrf.mxu2 }
  0xc8   :  { %366 = vmatmul.bf16.vlgmr.msra.gmra.mxu1 %v282_v55  ;;  %499 = vmatmul.bf16.vlgmr.msrb.gmra.mxu2 %v282_v55  ;;  %v2641_v0 = vadd.f32 %v2616_v49, %v248_v61  ;;  %v2098_v55 = vld [vmem:[#allocation8 + $0x58] sm:$0xff]  ;;  %v2097_v61 = vld [vmem:[#allocation8 + $0x50] sm:$0xff] }
  0xc9   :  { %v231_v56 = vpop.f32.mrf.mxu0  ;;  %990 = vmatpush.bf16.msrb.mxu3 %v2098_v55 }
  0xca   :  { %v2634_v59 = vadd.f32 %v2616_v49, %v231_v56  ;;  %v275_v3 = vmax.f32 %v2641_v0, 0.0 }
  0xcc   :  { %v268_v1 = vmax.f32 %v2634_v59, 0.0  ;;  %v286_v5 = vpack.c.bf16 %v275_v3, %v274_v63 }
  0xcd   :  { %991 = vmatpush.bf16.msrb.mxu3 %v2097_v61 }
  0xce   :  { %386 = vmatmul.bf16.vlgmr.msra.gmra.mxu3 %v286_v5 }
  0xcf   :  { %v251_v7 = vpop.f32.mrf.mxu2 }
  0xd0   :  { %v2655_v8 = vadd.f32 %v2616_v49, %v251_v7 }
  0xd1   :  { %v233_v60 = vpop.f32.mrf.mxu0 }
  0xd2   :  { %v2637_v62 = vadd.f32 %v2616_v49, %v233_v60  ;;  %v276_v13 = vmax.f32 %v2655_v8, 0.0  ;;  %v2105_v60 = vld [vmem:[#allocation10 + $0x50] sm:$0xff] }
  0xd3   :  { %1126 = vmatpush.bf16.msrb.mxu0 %v2105_v60 }
  0xd4   :  { %v269_v2 = vmax.f32 %v2637_v62, 0.0 }
  0xd6   :  { %v283_v4 = vpack.c.bf16 %v269_v2, %v268_v1 }
  0xd7   :  { %v253_v11 = vpop.f32.mrf.mxu2 }
  0xd8   :  { %371 = vmatmul.bf16.gmra.mxu1 %v283_v4  ;;  %504 = vmatmul.bf16.gmra.mxu2 %v283_v4  ;;  %v2665_v14 = vadd.f32 %v2616_v49, %v253_v11 }
  0xd9   :  { %v236_v6 = vpop.f32.mrf.mxu0 }
  0xda   :  { %v2658_v9 = vadd.f32 %v2616_v49, %v236_v6  ;;  %v277_v17 = vmax.f32 %v2665_v14, 0.0  ;;  %v2096_v6 = vld [vmem:[#allocation8 + $0x48] sm:$0xff] }
  0xdb   :  { %992 = vmatpush.bf16.msrb.mxu3 %v2096_v6  ;;  %v2730_v6 = vld [vmem:[%s3197_s4] ss:$0 sm:$0xff] }
  0xdc   :  { %v270_v15 = vmax.f32 %v2658_v9, 0.0  ;;  %v287_v19 = vpack.c.bf16 %v277_v17, %v276_v13 }
  0xde   :  { %391 = vmatmul.bf16.gmra.mxu3 %v287_v19 }
  0xdf   :  { %v256_v21 = vpop.f32.mrf.mxu2 }
  0xe0   :  { %v2679_v22 = vadd.f32 %v2616_v49, %v256_v21 }
  0xe1   :  { %v238_v10 = vpop.f32.mrf.mxu0 }
  0xe2   :  { %v2661_v12 = vadd.f32 %v2616_v49, %v238_v10  ;;  %v278_v27 = vmax.f32 %v2679_v22, 0.0 }
  0xe4   :  { %v271_v16 = vmax.f32 %v2661_v12, 0.0 }
  0xe6   :  { %v284_v18 = vpack.c.bf16 %v271_v16, %v270_v15 }
  0xe7   :  { %v258_v25 = vpop.f32.mrf.mxu2 }
  0xe8   :  { %376 = vmatmul.bf16.gmra.mxu1 %v284_v18  ;;  %509 = vmatmul.bf16.gmra.mxu2 %v284_v18  ;;  %v2689_v28 = vadd.f32 %v2616_v49, %v258_v25  ;;  %v2103_v18 = vld [vmem:[#allocation10 + $0x40] sm:$0xff] }
  0xe9   :  { %v241_v20 = vpop.f32.mrf.mxu0 }
  0xea   :  { %v2682_v23 = vadd.f32 %v2616_v49, %v241_v20  ;;  %v279_v31 = vmax.f32 %v2689_v28, 0.0 }
  0xec   :  { %v272_v29 = vmax.f32 %v2682_v23, 0.0  ;;  %v288_v33 = vpack.c.bf16 %v279_v31, %v278_v27 }
  0xee   :  { %396 = vmatmul.bf16.gmra.mxu3 %v288_v33 }
  0xef   :  { %v261_v34 = vpop.f32.mrf.mxu2 }
  0xf0   :  { %v2703_v35 = vadd.f32 %v2616_v49, %v261_v34 }
  0xf1   :  { %v243_v24 = vpop.f32.mrf.mxu0 }
  0xf2   :  { %v2685_v26 = vadd.f32 %v2616_v49, %v243_v24  ;;  %v280_v37 = vmax.f32 %v2703_v35, 0.0  ;;  %v2940_v35 = vld [vmem:[%s3199_s6 + $0x1] ss:$0 sm:$0xff] }
  0xf4   :  { %v273_v30 = vmax.f32 %v2685_v26, 0.0 }
  0xf6   :  { %v285_v32 = vpack.c.bf16 %v273_v30, %v272_v29 }
  0xf7   :  { %v263_v36 = vpop.f32.mrf.mxu2 }
  0xf8   :  { %381 = vmatmul.bf16.gmra.mxu1 %v285_v32  ;;  %514 = vmatmul.bf16.gmra.mxu2 %v285_v32  ;;  %v2707_v38 = vadd.f32 %v2616_v49, %v263_v36  ;;  %v2717_v49 = vld [vmem:[%s3199_s6] ss:$0 sm:$0xff] }
  0xfa   :  { %v281_v39 = vmax.f32 %v2707_v38, 0.0 }
  0xfc   :  { %v289_v40 = vpack.c.bf16 %v281_v39, %v280_v37 }
  0xfe   :  { %401 = vmatmul.bf16.gmra.mxu3 %v289_v40 }
 0x108   :  { %519 = vmatmul.bf16.gmra.mxu2 %v286_v5  ;;  %v2104_v5 = vld [vmem:[#allocation10 + $0x48] sm:$0xff] }
 0x109   :  { %1127 = vmatpush.bf16.msrb.mxu0 %v2104_v5 }
 0x10d   :  { %1128 = vmatpush.bf16.msrb.mxu0 %v2103_v18 }
 0x118   :  { %524 = vmatmul.bf16.gmra.mxu2 %v287_v19  ;;  %v2095_v19 = vld [vmem:[#allocation8 + $0x40] sm:$0xff] }
 0x119   :  { %993 = vmatpush.bf16.msrb.mxu3 %v2095_v19 }
 0x128   :  { %529 = vmatmul.bf16.gmra.mxu2 %v288_v33 }
 0x138   :  { %534 = vmatmul.bf16.gmra.mxu2 %v289_v40 }
 0x145   :  { %v367_v10 = vpop.f32.mrf.mxu1 }
 0x14b   :  { %v500_v56 = vpop.f32.mrf.mxu2 }
 0x14c   :  { %v501_v57 = vadd.f32 %v2717_v49, %v500_v56 }
 0x14d   :  { %v369_v34 = vpop.f32.mrf.mxu1 }
 0x14e   :  { %v1941_v4 = vmul.f32 -1.442695, %v501_v57 }
 0x150   :  { %2152 = vpow2.f32 %v1941_v4 }
 0x153   :  { %v502_v7 = vpop.f32.mrf.mxu2 }
 0x154   :  { %v503_v11 = vadd.f32 %v2717_v49, %v502_v7 }
 0x155   :  { %v2725_v4 = vpop.f32.mrf.mxu1 }
 0x156   :  { %v2153_v20 = vpop.eup %2152  ;;  %v1942_v21 = vmul.f32 -1.442695, %v503_v11 }
 0x157   :  { %v588_v24 = vadd.f32 1.0, %v2153_v20 }
 0x158   :  { %2154 = vpow2.f32 %v1942_v21 }
 0x159   :  { %2156 = vrcp.f32 %v588_v24  ;;  %v615_v47 = vand.u32 2147483648, %v588_v24  ;;  %vm609_vm1 = vweird.f32 %v588_v24  ;;  %v613_v56 = vand.u32 2147483647, %v588_v24 }
 0x15b   :  { %v505_v25 = vpop.f32.mrf.mxu2  ;;  %v616_v7 = vor.u32 1.1754944e-38, %v615_v47  ;;  %vm614_vm3 = vcmp.eq.f32.partialorder %v613_v56, 8.507059e+37 }
 0x15c   :  { %v506_v32 = vadd.f32 %v2717_v49, %v505_v25 }
 0x15d   :  { %v374_v56 = vpop.f32.mrf.mxu1 }
 0x15e   :  { %v2155_v33 = vpop.eup %2154  ;;  %v1943_v36 = vmul.f32 -1.442695, %v506_v32  ;;  %v368_v32 = vadd.f32 %v2730_v6, %v367_v10 }
 0x15f   :  { %v2157_v40 = vpop.eup %2156  ;;  %v589_v41 = vadd.f32 1.0, %v2155_v33  ;;  %v370_v33 = vadd.f32 %v2730_v6, %v369_v34 }
 0x160   :  { %v605_v42 = vmul.f32 %v2157_v40, %v588_v24  ;;  %2158 = vpow2.f32 %v1943_v36  ;;  %vm610_vm0 = vweird.f32 %v2157_v40 }
 0x161   :  { %2160 = vrcp.f32 %v589_v41  ;;  %vm611_vm2 = vmor %vm609_vm1, %vm610_vm0  ;;  %v630_v20 = vand.u32 2147483648, %v589_v41  ;;  %v628_v25 = vand.u32 2147483647, %v589_v41  ;;  %vm624_vm5 = vweird.f32 %v589_v41 }
 0x162   :  { %v606_v43 = vsub.f32 1.0, %v605_v42  ;;  %v408_v34 = vmax.f32 %v370_v33, 0.0 }
 0x163   :  { %v507_v44 = vpop.f32.mrf.mxu2  ;;  %vm629_vm7 = vcmp.eq.f32.partialorder %v628_v25, 8.507059e+37 }
 0x164   :  { %v508_v45 = vadd.f32 %v2717_v49, %v507_v44  ;;  %v607_v46 = vmul.f32 %v2157_v40, %v606_v43 }
 0x166   :  { %v2159_v48 = vpop.eup %2158  ;;  %v1944_v51 = vmul.f32 -1.442695, %v508_v45  ;;  %v608_v55 = vadd.f32 %v2157_v40, %v607_v46  ;;  %v631_v46 = vor.u32 1.1754944e-38, %v630_v20 }
 0x167   :  { %v2161_v57 = vpop.eup %2160  ;;  %v2723_v60 = vadd.f32 1.0, %v2159_v48 }
 0x168   :  { %v620_v61 = vmul.f32 %v2161_v57, %v589_v41  ;;  %2162 = vpow2.f32 %v1944_v51  ;;  %v612_v5 = vsel %vm611_vm2, %v2157_v40, %v608_v55  ;;  %vm625_vm4 = vweird.f32 %v2161_v57 }
 0x169   :  { %2164 = vrcp.f32 %v2723_v60  ;;  %v617_v19 = vsel %vm614_vm3, %v616_v7, %v612_v5  ;;  %vm626_vm6 = vmor %vm624_vm5, %vm625_vm4  ;;  %v407_v51 = vmax.f32 %v368_v32, 0.0  ;;  %vm639_vm9 = vweird.f32 %v2723_v60 }
 0x16a   :  { %v621_v11 = vsub.f32 1.0, %v620_v61  ;;  %v860_v43 = vsub.f32 1.0, %v617_v19 }
 0x16b   :  { %v510_v18 = vpop.f32.mrf.mxu2  ;;  %v844_v7 = vmul.f32 %v617_v19, %v407_v51 }
 0x16c   :  { %v511_v21 = vadd.f32 %v2717_v49, %v510_v18  ;;  %v622_v24 = vmul.f32 %v2161_v57, %v621_v11  ;;  %v876_v41 = vmul.f32 %v860_v43, %v266_v53 }
 0x16e   :  { %v2163_v36 = vpop.eup %2162  ;;  %v1945_v40 = vmul.f32 -1.442695, %v511_v21  ;;  %v623_v42 = vadd.f32 %v2161_v57, %v622_v24  ;;  %v643_v21 = vand.u32 2147483647, %v2723_v60  ;;  %v645_v24 = vand.u32 2147483648, %v2723_v60 }
 0x16f   :  { %v2165_v44 = vpop.eup %2164  ;;  %v2736_v45 = vadd.f32 1.0, %v2163_v36  ;;  %v2747_v33 = vadd.f32 %v876_v41, %v844_v7 }
 0x170   :  { %v635_v47 = vmul.f32 %v2165_v44, %v2723_v60  ;;  %2166 = vpow2.f32 %v1945_v40  ;;  %v627_v48 = vsel %vm626_vm6, %v2161_v57, %v623_v42  ;;  %vm640_vm8 = vweird.f32 %v2165_v44  ;;  %v2759_v60 = vpop.f32.mrf.mxu1 }
 0x171   :  { %2168 = vrcp.f32 %v2736_v45  ;;  %v632_v10 = vsel %vm629_vm7, %v631_v46, %v627_v48  ;;  %vm641_vm10 = vmor %vm639_vm9, %vm640_vm8  ;;  %v646_v42 = vor.u32 1.1754944e-38, %v645_v24  ;;  %vm644_vm11 = vcmp.eq.f32.partialorder %v643_v21, 8.507059e+37 }
 0x172   :  { %v636_v55 = vsub.f32 1.0, %v635_v47  ;;  %v861_v61 = vsub.f32 1.0, %v632_v10  ;;  %v845_v18 = vmul.f32 %v632_v10, %v408_v34  ;;  %v660_v48 = vand.u32 2147483648, %v2736_v45 }
 0x173   :  { %v512_v5 = vpop.f32.mrf.mxu2  ;;  %v658_v34 = vand.u32 2147483647, %v2736_v45  ;;  %vm654_vm13 = vweird.f32 %v2736_v45 }
 0x174   :  { %v513_v11 = vadd.f32 %v2717_v49, %v512_v5  ;;  %v877_v57 = vmul.f32 %v861_v61, %v267_v54  ;;  %v637_v20 = vmul.f32 %v2165_v44, %v636_v55  ;;  %v375_v55 = vadd.f32 %v2730_v6, %v374_v56 }
 0x175   :  { %vm659_vm15 = vcmp.eq.f32.partialorder %v658_v34, 8.507059e+37 }
 0x176   :  { %v2167_v25 = vpop.eup %2166  ;;  %v1946_v32 = vmul.f32 -1.442695, %v513_v11  ;;  %v2749_v50 = vadd.f32 %v877_v57, %v845_v18  ;;  %v638_v53 = vadd.f32 %v2165_v44, %v637_v20  ;;  %v661_v57 = vor.u32 1.1754944e-38, %v660_v48 }
 0x177   :  { %v2169_v19 = vpop.eup %2168  ;;  %v2751_v36 = vadd.f32 1.0, %v2167_v25  ;;  %v410_v56 = vmax.f32 %v375_v55, 0.0 }
 0x178   :  { %v650_v52 = vmul.f32 %v2169_v19, %v2736_v45  ;;  %2170 = vpow2.f32 %v1946_v32  ;;  %v908_v54 = vpack.c.bf16 %v2749_v50, %v2747_v33  ;;  %v642_v40 = vsel %vm641_vm10, %v2165_v44, %v638_v53 }
 0x179   :  { %2172 = vrcp.f32 %v2751_v36  ;;  %v647_v47 = vsel %vm644_vm11, %v646_v42, %v642_v40  ;;  %vm655_vm12 = vweird.f32 %v2169_v19  ;;  %v373_v44 = vadd.f32 %v2730_v6, %v2725_v4 }
 0x17a   :  { %v651_v43 = vsub.f32 1.0, %v650_v52  ;;  %994 = vmatmul.bf16.vlgmr.msrb.gmra.mxu3 %v908_v54  ;;  %1129 = vmatmul.bf16.vlgmr.msrb.gmra.mxu0 %v908_v54  ;;  %v862_v7 = vsub.f32 1.0, %v647_v47  ;;  %vm656_vm14 = vmor %vm654_vm13, %vm655_vm12  ;;  %vm669_vm1 = vweird.f32 %v2751_v36 }
 0x17b   :  { %v515_v46 = vpop.f32.mrf.mxu2  ;;  %v409_v24 = vmax.f32 %v373_v44, 0.0 }
 0x17c   :  { %v516_v51 = vadd.f32 %v2717_v49, %v515_v46  ;;  %v652_v10 = vmul.f32 %v2169_v19, %v651_v43  ;;  %v878_v45 = vmul.f32 %v862_v7, %v268_v1  ;;  %v673_v43 = vand.u32 2147483647, %v2751_v36 }
 0x17d   :  { %v846_v52 = vmul.f32 %v647_v47, %v409_v24  ;;  %v675_v46 = vand.u32 2147483648, %v2751_v36 }
 0x17e   :  { %v2171_v61 = vpop.eup %2170  ;;  %v1947_v41 = vmul.f32 -1.442695, %v516_v51  ;;  %v653_v5 = vadd.f32 %v2169_v19, %v652_v10  ;;  %v379_v51 = vpop.f32.mrf.mxu1  ;;  %vm674_vm3 = vcmp.eq.f32.partialorder %v673_v43, 8.507059e+37 }
 0x17f   :  { %v2173_v11 = vpop.eup %2172  ;;  %v2767_v18 = vadd.f32 1.0, %v2171_v61  ;;  %v2779_v1 = vadd.f32 %v878_v45, %v846_v52  ;;  %v676_v55 = vor.u32 1.1754944e-38, %v675_v46  ;;  %v380_v24 = vadd.f32 %v2730_v6, %v379_v51 }
 0x180   :  { %v665_v20 = vmul.f32 %v2173_v11, %v2751_v36  ;;  %2174 = vpow2.f32 %v1947_v41  ;;  %v657_v21 = vsel %vm656_vm14, %v2169_v19, %v653_v5  ;;  %vm670_vm0 = vweird.f32 %v2173_v11 }
 0x181   :  { %2176 = vrcp.f32 %v2767_v18  ;;  %v662_v4 = vsel %vm659_vm15, %v661_v57, %v657_v21  ;;  %vm671_vm2 = vmor %vm669_vm1, %vm670_vm0  ;;  %v690_v7 = vand.u32 2147483648, %v2767_v18  ;;  %v688_v21 = vand.u32 2147483647, %v2767_v18 }
 0x182   :  { %v666_v25 = vsub.f32 1.0, %v665_v20  ;;  %v863_v32 = vsub.f32 1.0, %v662_v4  ;;  %v847_v40 = vmul.f32 %v662_v4, %v410_v56  ;;  %vm684_vm5 = vweird.f32 %v2767_v18 }
 0x183   :  { %v517_v53 = vpop.f32.mrf.mxu2  ;;  %v691_v52 = vor.u32 1.1754944e-38, %v690_v7  ;;  %vm689_vm7 = vcmp.eq.f32.partialorder %v688_v21, 8.507059e+37  ;;  %v412_v43 = vmax.f32 %v380_v24, 0.0 }
 0x184   :  { %v518_v54 = vadd.f32 %v2717_v49, %v517_v53  ;;  %v879_v19 = vmul.f32 %v863_v32, %v269_v2  ;;  %v667_v42 = vmul.f32 %v2173_v11, %v666_v25 }
 0x186   :  { %v2175_v48 = vpop.eup %2174  ;;  %v1948_v59 = vmul.f32 -1.442695, %v518_v54  ;;  %v2781_v47 = vadd.f32 %v879_v19, %v847_v40  ;;  %v668_v10 = vadd.f32 %v2173_v11, %v667_v42  ;;  %v382_v54 = vpop.f32.mrf.mxu1 }
 0x187   :  { %v2177_v34 = vpop.eup %2176  ;;  %v2783_v44 = vadd.f32 1.0, %v2175_v48 }
 0x188   :  { %v680_v62 = vmul.f32 %v2177_v34, %v2767_v18  ;;  %2178 = vpow2.f32 %v1948_v59  ;;  %v909_v2 = vpack.c.bf16 %v2781_v47, %v2779_v1  ;;  %v672_v36 = vsel %vm671_vm2, %v2173_v11, %v668_v10 }
 0x189   :  { %2180 = vrcp.f32 %v2783_v44  ;;  %v677_v5 = vsel %vm674_vm3, %v676_v55, %v672_v36  ;;  %vm685_vm4 = vweird.f32 %v2177_v34  ;;  %v378_v11 = vadd.f32 %v2730_v6, %v2759_v60  ;;  %v2806_v36 = vpop.f32.mrf.mxu3 }
 0x18a   :  { %v681_v61 = vsub.f32 1.0, %v680_v62  ;;  %999 = vmatmul.bf16.gmra.mxu3 %v909_v2  ;;  %1134 = vmatmul.bf16.gmra.mxu0 %v909_v2  ;;  %v864_v32 = vsub.f32 1.0, %v677_v5  ;;  %vm686_vm6 = vmor %vm684_vm5, %vm685_vm4  ;;  %vm699_vm9 = vweird.f32 %v2783_v44  ;;  %v703_v55 = vand.u32 2147483647, %v2783_v44 }
 0x18b   :  { %v520_v41 = vpop.f32.mrf.mxu2  ;;  %v411_v60 = vmax.f32 %v378_v11, 0.0 }
 0x18c   :  { %v521_v57 = vadd.f32 %v2717_v49, %v520_v41  ;;  %v682_v20 = vmul.f32 %v2177_v34, %v681_v61  ;;  %v880_v18 = vmul.f32 %v864_v32, %v270_v15  ;;  %v705_v61 = vand.u32 2147483648, %v2783_v44 }
 0x18d   :  { %v848_v59 = vmul.f32 %v677_v5, %v411_v60  ;;  %vm704_vm11 = vcmp.eq.f32.partialorder %v703_v55, 8.507059e+37 }
 0x18e   :  { %v2179_v4 = vpop.eup %2178  ;;  %v1949_v56 = vmul.f32 -1.442695, %v521_v57  ;;  %v683_v25 = vadd.f32 %v2177_v34, %v682_v20  ;;  %v384_v11 = vpop.f32.mrf.mxu1 }
 0x18f   :  { %v2181_v45 = vpop.eup %2180  ;;  %v2797_v53 = vadd.f32 1.0, %v2179_v4  ;;  %v2811_v41 = vadd.f32 %v880_v18, %v848_v59 }
 0x190   :  { %v695_v40 = vmul.f32 %v2181_v45, %v2783_v44  ;;  %2182 = vpow2.f32 %v1949_v56  ;;  %v687_v19 = vsel %vm686_vm6, %v2177_v34, %v683_v25  ;;  %vm700_vm8 = vweird.f32 %v2181_v45 }
 0x191   :  { %2184 = vrcp.f32 %v2797_v53  ;;  %v692_v42 = vsel %vm689_vm7, %v691_v52, %v687_v19  ;;  %vm701_vm10 = vmor %vm699_vm9, %vm700_vm8  ;;  %v706_v44 = vor.u32 1.1754944e-38, %v705_v61  ;;  %v720_v25 = vand.u32 2147483648, %v2797_v53  ;;  %v389_v18 = vpop.f32.mrf.mxu3 }
 0x192   :  { %v696_v46 = vsub.f32 1.0, %v695_v40  ;;  %v865_v48 = vsub.f32 1.0, %v692_v42  ;;  %v849_v62 = vmul.f32 %v692_v42, %v412_v43  ;;  %v718_v40 = vand.u32 2147483647, %v2797_v53 }
 0x193   :  { %v522_v51 = vpop.f32.mrf.mxu2  ;;  %v385_v19 = vadd.f32 %v2730_v6, %v384_v11  ;;  %vm714_vm13 = vweird.f32 %v2797_v53  ;;  %v721_v59 = vor.u32 1.1754944e-38, %v720_v25 }
 0x194   :  { %v523_v10 = vadd.f32 %v2717_v49, %v522_v51  ;;  %v881_v34 = vmul.f32 %v865_v48, %v271_v16  ;;  %v697_v2 = vmul.f32 %v2181_v45, %v696_v46  ;;  %vm719_vm15 = vcmp.eq.f32.partialorder %v718_v40, 8.507059e+37 }
 0x196   :  { %v2183_v9 = vpop.eup %2182  ;;  %v1950_v15 = vmul.f32 -1.442695, %v523_v10  ;;  %v2813_v5 = vadd.f32 %v881_v34, %v849_v62  ;;  %v698_v7 = vadd.f32 %v2181_v45, %v697_v2  ;;  %v414_v2 = vmax.f32 %v385_v19, 0.0 }
 0x197   :  { %v2185_v57 = vpop.eup %2184  ;;  %v2815_v20 = vadd.f32 1.0, %v2183_v9 }
 0x198   :  { %v710_v12 = vmul.f32 %v2185_v57, %v2797_v53  ;;  %2186 = vpow2.f32 %v1950_v15  ;;  %v910_v16 = vpack.c.bf16 %v2813_v5, %v2811_v41  ;;  %v702_v21 = vsel %vm701_vm10, %v2181_v45, %v698_v7 }
 0x199   :  { %2188 = vrcp.f32 %v2815_v20  ;;  %v707_v56 = vsel %vm704_vm11, %v706_v44, %v702_v21  ;;  %vm715_vm12 = vweird.f32 %v2185_v57  ;;  %v383_v45 = vadd.f32 %v2730_v6, %v382_v54 }
 0x19a   :  { %v711_v24 = vsub.f32 1.0, %v710_v12  ;;  %1004 = vmatmul.bf16.gmra.mxu3 %v910_v16  ;;  %1139 = vmatmul.bf16.gmra.mxu0 %v910_v16  ;;  %v866_v46 = vsub.f32 1.0, %v707_v56  ;;  %vm716_vm14 = vmor %vm714_vm13, %vm715_vm12  ;;  %vm729_vm1 = vweird.f32 %v2815_v20  ;;  %v733_v21 = vand.u32 2147483647, %v2815_v20 }
 0x19b   :  { %v525_v4 = vpop.f32.mrf.mxu2  ;;  %v413_v54 = vmax.f32 %v383_v45, 0.0  ;;  %v735_v44 = vand.u32 2147483648, %v2815_v20 }
 0x19c   :  { %v526_v32 = vadd.f32 %v2717_v49, %v525_v4  ;;  %v712_v52 = vmul.f32 %v2185_v57, %v711_v24  ;;  %v882_v53 = vmul.f32 %v866_v46, %v272_v29  ;;  %vm734_vm3 = vcmp.eq.f32.partialorder %v733_v21, 8.507059e+37 }
 0x19d   :  { %v850_v15 = vmul.f32 %v707_v56, %v413_v54 }
 0x19e   :  { %v2187_v60 = vpop.eup %2186  ;;  %v1951_v42 = vmul.f32 -1.442695, %v526_v32  ;;  %v713_v43 = vadd.f32 %v2185_v57, %v712_v52  ;;  %v736_v52 = vor.u32 1.1754944e-38, %v735_v44 }
 0x19f   :  { %v2189_v48 = vpop.eup %2188  ;;  %v2828_v51 = vadd.f32 1.0, %v2187_v60  ;;  %v2840_v23 = vadd.f32 %v882_v53, %v850_v15 }
 0x1a0   :  { %v725_v10 = vmul.f32 %v2189_v48, %v2815_v20  ;;  %2190 = vpow2.f32 %v1951_v42  ;;  %v717_v62 = vsel %vm716_vm14, %v2185_v57, %v713_v43  ;;  %vm730_vm0 = vweird.f32 %v2189_v48  ;;  %v2850_v20 = vpop.f32.mrf.mxu3 }
 0x1a1   :  { %2192 = vrcp.f32 %v2828_v51  ;;  %v722_v34 = vsel %vm719_vm15, %v721_v59, %v717_v62  ;;  %vm731_vm2 = vmor %vm729_vm1, %vm730_vm0  ;;  %v750_v60 = vand.u32 2147483648, %v2828_v51  ;;  %v748_v46 = vand.u32 2147483647, %v2828_v51 }
 0x1a2   :  { %v726_v55 = vsub.f32 1.0, %v725_v10  ;;  %v867_v61 = vsub.f32 1.0, %v722_v34  ;;  %v851_v12 = vmul.f32 %v722_v34, %v414_v2  ;;  %v390_v59 = vadd.f32 %v2730_v6, %v389_v18 }
 0x1a3   :  { %v527_v9 = vpop.f32.mrf.mxu2  ;;  %vm744_vm5 = vweird.f32 %v2828_v51  ;;  %vm749_vm7 = vcmp.eq.f32.partialorder %v748_v46, 8.507059e+37 }
 0x1a4   :  { %v528_v7 = vadd.f32 %v2717_v49, %v527_v9  ;;  %v883_v57 = vmul.f32 %v867_v61, %v273_v30  ;;  %v727_v16 = vmul.f32 %v2189_v48, %v726_v55  ;;  %v751_v61 = vor.u32 1.1754944e-38, %v750_v60 }
 0x1a5   :  { %v416_v18 = vmax.f32 %v390_v59, 0.0 }
 0x1a6   :  { %v2191_v11 = vpop.eup %2190  ;;  %v1952_v24 = vmul.f32 -1.442695, %v528_v7  ;;  %v2842_v29 = vadd.f32 %v883_v57, %v851_v12  ;;  %v728_v4 = vadd.f32 %v2189_v48, %v727_v16 }
 0x1a7   :  { %v2193_v56 = vpop.eup %2192  ;;  %v2844_v25 = vadd.f32 1.0, %v2191_v11 }
 0x1a8   :  { %v740_v26 = vmul.f32 %v2193_v56, %v2828_v51  ;;  %2194 = vpow2.f32 %v1952_v24  ;;  %v911_v30 = vpack.c.bf16 %v2842_v29, %v2840_v23  ;;  %v732_v32 = vsel %vm731_vm2, %v2189_v48, %v728_v4  ;;  %v394_v57 = vpop.f32.mrf.mxu3 }
 0x1a9   :  { %2196 = vrcp.f32 %v2844_v25  ;;  %v737_v19 = vsel %vm734_vm3, %v736_v52, %v732_v32  ;;  %vm745_vm4 = vweird.f32 %v2193_v56  ;;  %v388_v48 = vadd.f32 %v2730_v6, %v2806_v36 }
 0x1aa   :  { %v741_v40 = vsub.f32 1.0, %v740_v26  ;;  %1009 = vmatmul.bf16.gmra.mxu3 %v911_v30  ;;  %1144 = vmatmul.bf16.gmra.mxu0 %v911_v30  ;;  %v868_v34 = vsub.f32 1.0, %v737_v19  ;;  %vm746_vm6 = vmor %vm744_vm5, %vm745_vm4  ;;  %vm759_vm9 = vweird.f32 %v2844_v25  ;;  %v765_v26 = vand.u32 2147483648, %v2844_v25 }
 0x1ab   :  { %v530_v45 = vpop.f32.mrf.mxu2  ;;  %v415_v15 = vmax.f32 %v388_v48, 0.0 }
 0x1ac   :  { %v531_v42 = vadd.f32 %v2717_v49, %v530_v45  ;;  %v742_v43 = vmul.f32 %v2193_v56, %v741_v40  ;;  %v884_v51 = vmul.f32 %v868_v34, %v274_v63  ;;  %v395_v34 = vadd.f32 %v2730_v6, %v394_v57 }
 0x1ad   :  { %v852_v21 = vmul.f32 %v737_v19, %v415_v15 }
 0x1ae   :  { %v2195_v10 = vpop.eup %2194  ;;  %v1953_v62 = vmul.f32 -1.442695, %v531_v42  ;;  %v743_v54 = vadd.f32 %v2193_v56, %v742_v43  ;;  %v2118_v42 = vld [vmem:[#allocation11 + $0x38] sm:$0xff] }
 0x1af   :  { %v2197_v2 = vpop.eup %2196  ;;  %v2860_v55 = vadd.f32 1.0, %v2195_v10  ;;  %v2872_v63 = vadd.f32 %v884_v51, %v852_v21  ;;  %1614 = vmatpush.bf16.msrb.mxu1 %v2118_v42 }
 0x1b0   :  { %v755_v53 = vmul.f32 %v2197_v2, %v2844_v25  ;;  %2198 = vpow2.f32 %v1953_v62  ;;  %v747_v9 = vsel %vm746_vm6, %v2193_v56, %v743_v54  ;;  %vm760_vm8 = vweird.f32 %v2197_v2 }
 0x1b1   :  { %2200 = vrcp.f32 %v2860_v55  ;;  %v752_v36 = vsel %vm749_vm7, %v751_v61, %v747_v9  ;;  %v763_v56 = vand.u32 2147483647, %v2844_v25  ;;  %vm761_vm10 = vmor %vm759_vm9, %vm760_vm8  ;;  %v766_v25 = vor.u32 1.1754944e-38, %v765_v26 }
 0x1b2   :  { %v756_v7 = vsub.f32 1.0, %v755_v53  ;;  %v869_v12 = vsub.f32 1.0, %v752_v36  ;;  %v853_v11 = vmul.f32 %v752_v36, %v416_v18  ;;  %v780_v48 = vand.u32 2147483648, %v2860_v55 }
 0x1b3   :  { %v532_v16 = vpop.f32.mrf.mxu2  ;;  %vm764_vm11 = vcmp.eq.f32.partialorder %v763_v56, 8.507059e+37  ;;  %v778_v62 = vand.u32 2147483647, %v2860_v55  ;;  %v393_v54 = vadd.f32 %v2730_v6, %v2850_v20  ;;  %vm774_vm13 = vweird.f32 %v2860_v55 }
 0x1b4   :  { %v533_v44 = vadd.f32 %v2717_v49, %v532_v16  ;;  %v885_v24 = vmul.f32 %v869_v12, %v275_v3  ;;  %v757_v4 = vmul.f32 %v2197_v2, %v756_v7  ;;  %v781_v7 = vor.u32 1.1754944e-38, %v780_v48 }
 0x1b5   :  { %vm779_vm15 = vcmp.eq.f32.partialorder %v778_v62, 8.507059e+37  ;;  %v417_v20 = vmax.f32 %v393_v54, 0.0  ;;  %v418_v16 = vmax.f32 %v395_v34, 0.0  ;;  %v2116_v62 = vld [vmem:[#allocation11 + $0x28] sm:$0xff] }
 0x1b6   :  { %v2199_v30 = vpop.eup %2198  ;;  %v1954_v58 = vmul.f32 -1.442695, %v533_v44  ;;  %v2874_v32 = vadd.f32 %v885_v24, %v853_v11  ;;  %v758_v52 = vadd.f32 %v2197_v2, %v757_v4 }
 0x1b7   :  { %v2201_v40 = vpop.eup %2200  ;;  %v2876_v45 = vadd.f32 1.0, %v2199_v30 }
 0x1b8   :  { %v770_v0 = vmul.f32 %v2201_v40, %v2860_v55  ;;  %2202 = vpow2.f32 %v1954_v58  ;;  %v912_v3 = vpack.c.bf16 %v2874_v32, %v2872_v63  ;;  %v762_v19 = vsel %vm761_vm10, %v2197_v2, %v758_v52  ;;  %v397_v2 = vpop.f32.mrf.mxu3 }
 0x1b9   :  { %2204 = vrcp.f32 %v2876_v45  ;;  %v767_v46 = vsel %vm764_vm11, %v766_v25, %v762_v19  ;;  %vm775_vm12 = vweird.f32 %v2201_v40  ;;  %vm789_vm1 = vweird.f32 %v2876_v45 }
 0x1ba   :  { %v771_v60 = vsub.f32 1.0, %v770_v0  ;;  %1014 = vmatmul.bf16.gmra.mxu3 %v912_v3  ;;  %1149 = vmatmul.bf16.gmra.mxu0 %v912_v3  ;;  %v870_v15 = vsub.f32 1.0, %v767_v46  ;;  %vm776_vm14 = vmor %vm774_vm13, %vm775_vm12  ;;  %v854_v24 = vmul.f32 %v767_v46, %v417_v20  ;;  %v793_v58 = vand.u32 2147483647, %v2876_v45 }
 0x1bb   :  { %v535_v43 = vpop.f32.mrf.mxu2  ;;  %v795_v52 = vand.u32 2147483648, %v2876_v45  ;;  %v398_v54 = vadd.f32 %v2730_v6, %v397_v2 }
 0x1bc   :  { %v536_v59 = vadd.f32 %v2717_v49, %v535_v43  ;;  %v772_v10 = vmul.f32 %v2201_v40, %v771_v60  ;;  %v886_v55 = vmul.f32 %v870_v15, %v276_v13  ;;  %vm794_vm3 = vcmp.eq.f32.partialorder %v793_v58, 8.507059e+37  ;;  %v2117_v43 = vld [vmem:[#allocation11 + $0x30] sm:$0xff] }
 0x1bd   :  { %1615 = vmatpush.bf16.msrb.mxu1 %v2117_v43  ;;  %v419_v20 = vmax.f32 %v398_v54, 0.0 }
 0x1be   :  { %v2203_v61 = vpop.eup %2202  ;;  %v1955_v53 = vmul.f32 -1.442695, %v536_v59  ;;  %v773_v9 = vadd.f32 %v2201_v40, %v772_v10  ;;  %v2902_v8 = vadd.f32 %v886_v55, %v854_v24 }
 0x1bf   :  { %v2205_v36 = vpop.eup %2204  ;;  %v2890_v18 = vadd.f32 1.0, %v2203_v61 }
 0x1c0   :  { %v785_v12 = vmul.f32 %v2205_v36, %v2876_v45  ;;  %2206 = vpow2.f32 %v1955_v53  ;;  %v777_v51 = vsel %vm776_vm14, %v2201_v40, %v773_v9  ;;  %vm790_vm0 = vweird.f32 %v2205_v36 }
 0x1c1   :  { %2208 = vrcp.f32 %v2890_v18  ;;  %v782_v57 = vsel %vm779_vm15, %v781_v7, %v777_v51  ;;  %vm791_vm2 = vmor %vm789_vm1, %vm790_vm0  ;;  %v796_v45 = vor.u32 1.1754944e-38, %v795_v52  ;;  %v810_v48 = vand.u32 2147483648, %v2890_v18  ;;  %1616 = vmatpush.bf16.msrb.mxu1 %v2116_v62 }
 0x1c2   :  { %v786_v21 = vsub.f32 1.0, %v785_v12  ;;  %v871_v44 = vsub.f32 1.0, %v782_v57  ;;  %v855_v56 = vmul.f32 %v782_v57, %v418_v16  ;;  %v808_v10 = vand.u32 2147483647, %v2890_v18 }
 0x1c3   :  { %v537_v11 = vpop.f32.mrf.mxu2  ;;  %vm804_vm5 = vweird.f32 %v2890_v18  ;;  %v811_v7 = vor.u32 1.1754944e-38, %v810_v48 }
 0x1c4   :  { %v538_v4 = vadd.f32 %v2717_v49, %v537_v11  ;;  %v887_v26 = vmul.f32 %v871_v44, %v277_v17  ;;  %v787_v30 = vmul.f32 %v2205_v36, %v786_v21  ;;  %v399_v49 = vpop.f32.mrf.mxu3  ;;  %vm809_vm7 = vcmp.eq.f32.partialorder %v808_v10, 8.507059e+37 }
 0x1c5   :  { %v400_v61 = vadd.f32 %v2730_v6, %v399_v49 }
 0x1c6   :  { %v2207_v40 = vpop.eup %2206  ;;  %v1956_v0 = vmul.f32 -1.442695, %v538_v4  ;;  %v2904_v13 = vadd.f32 %v887_v26, %v855_v56  ;;  %v788_v3 = vadd.f32 %v2205_v36, %v787_v30 }
 0x1c7   :  { %v2209_v19 = vpop.eup %2208  ;;  %v602_v25 = vadd.f32 1.0, %v2207_v40  ;;  %v420_v2 = vmax.f32 %v400_v61, 0.0 }
 0x1c8   :  { %v800_v14 = vmul.f32 %v2209_v19, %v2890_v18  ;;  %2210 = vpow2.f32 %v1956_v0  ;;  %v913_v17 = vpack.c.bf16 %v2904_v13, %v2902_v8  ;;  %v792_v60 = vsel %vm791_vm2, %v2205_v36, %v788_v3 }
 0x1c9   :  { %2212 = vrcp.f32 %v602_v25  ;;  %v797_v46 = vsel %vm794_vm3, %v796_v45, %v792_v60  ;;  %vm805_vm4 = vweird.f32 %v2209_v19  ;;  %vm819_vm9 = vweird.f32 %v602_v25 }
 0x1ca   :  { %v801_v42 = vsub.f32 1.0, %v800_v14  ;;  %1019 = vmatmul.bf16.gmra.mxu3 %v913_v17  ;;  %1154 = vmatmul.bf16.gmra.mxu0 %v913_v17  ;;  %v872_v9 = vsub.f32 1.0, %v797_v46  ;;  %vm806_vm6 = vmor %vm804_vm5, %vm805_vm4  ;;  %v856_v18 = vmul.f32 %v797_v46, %v419_v20  ;;  %v825_v56 = vand.u32 2147483648, %v602_v25 }
 0x1cb   :  { %v823_v52 = vand.u32 2147483647, %v602_v25 }
 0x1cc   :  { %v802_v59 = vmul.f32 %v2209_v19, %v801_v42  ;;  %v402_v57 = vpop.f32.mrf.mxu3  ;;  %v888_v55 = vmul.f32 %v872_v9, %v278_v27  ;;  %v826_v3 = vor.u32 1.1754944e-38, %v825_v56 }
 0x1cd   :  { %vm824_vm11 = vcmp.eq.f32.partialorder %v823_v52, 8.507059e+37 }
 0x1ce   :  { %v2211_v34 = vpop.eup %2210  ;;  %v803_v53 = vadd.f32 %v2209_v19, %v802_v59  ;;  %v2919_v26 = vadd.f32 %v888_v55, %v856_v18  ;;  %v2111_v55 = vld [vmem:[#allocation11] sm:$0xff] }
 0x1cf   :  { %v2213_v15 = vpop.eup %2212  ;;  %v603_v36 = vadd.f32 1.0, %v2211_v34 }
 0x1d0   :  { %v815_v12 = vmul.f32 %v2213_v15, %v602_v25  ;;  %v807_v51 = vsel %vm806_vm6, %v2209_v19, %v803_v53  ;;  %vm820_vm8 = vweird.f32 %v2213_v15  ;;  %v403_v25 = vadd.f32 %v2730_v6, %v402_v57  ;;  %v2112_v57 = vld [vmem:[#allocation11 + $0x8] sm:$0xff] }
 0x1d1   :  { %2214 = vrcp.f32 %v603_v36  ;;  %v812_v16 = vsel %vm809_vm7, %v811_v7, %v807_v51  ;;  %vm821_vm10 = vmor %vm819_vm9, %vm820_vm8  ;;  %v840_v49 = vand.u32 2147483648, %v603_v36  ;;  %v838_v17 = vand.u32 2147483647, %v603_v36  ;;  %v2114_v7 = vld [vmem:[#allocation11 + $0x18] sm:$0xff] }
 0x1d2   :  { %v816_v21 = vsub.f32 1.0, %v815_v12  ;;  %v873_v44 = vsub.f32 1.0, %v812_v16  ;;  %v857_v11 = vmul.f32 %v812_v16, %v420_v2  ;;  %vm834_vm13 = vweird.f32 %v603_v36  ;;  %v2113_v12 = vld [vmem:[#allocation11 + $0x10] sm:$0xff] }
 0x1d3   :  { %v841_v43 = vor.u32 1.1754944e-38, %v840_v49  ;;  %vm839_vm15 = vcmp.eq.f32.partialorder %v838_v17, 8.507059e+37  ;;  %v421_v59 = vmax.f32 %v403_v25, 0.0 }
 0x1d4   :  { %v889_v24 = vmul.f32 %v873_v44, %v279_v31  ;;  %v817_v4 = vmul.f32 %v2213_v15, %v816_v21  ;;  %v404_v31 = vpop.f32.mrf.mxu3 }
 0x1d5   :  { %v405_v60 = vadd.f32 %v2730_v6, %v404_v31 }
 0x1d6   :  { %v2921_v30 = vadd.f32 %v889_v24, %v857_v11  ;;  %v818_v58 = vadd.f32 %v2213_v15, %v817_v4 }
 0x1d7   :  { %v2215_v40 = vpop.eup %2214  ;;  %v422_v10 = vmax.f32 %v405_v60, 0.0 }
 0x1d8   :  { %v830_v0 = vmul.f32 %v2215_v40, %v603_v36  ;;  %v914_v22 = vpack.c.bf16 %v2921_v30, %v2919_v26  ;;  %v822_v27 = vsel %vm821_vm10, %v2213_v15, %v818_v58  ;;  %vm835_vm12 = vweird.f32 %v2215_v40  ;;  %v2115_v36 = vld [vmem:[#allocation11 + $0x20] sm:$0xff] }
 0x1d9   :  { %v827_v19 = vsel %vm824_vm11, %v826_v3, %v822_v27  ;;  %vm836_vm14 = vmor %vm834_vm13, %vm835_vm12  ;;  %1617 = vmatpush.bf16.msrb.mxu1 %v2115_v36 }
 0x1da   :  { %v831_v28 = vsub.f32 1.0, %v830_v0  ;;  %1024 = vmatmul.bf16.gmra.mxu3 %v914_v22  ;;  %1159 = vmatmul.bf16.gmra.mxu0 %v914_v22  ;;  %v874_v42 = vsub.f32 1.0, %v827_v19  ;;  %v858_v34 = vmul.f32 %v827_v19, %v421_v59 }
 0x1dc   :  { %v832_v14 = vmul.f32 %v2215_v40, %v831_v28  ;;  %v890_v54 = vmul.f32 %v874_v42, %v280_v37 }
 0x1dd   :  { %1618 = vmatpush.bf16.msrb.mxu1 %v2114_v7 }
 0x1de   :  { %v833_v45 = vadd.f32 %v2215_v40, %v832_v14  ;;  %v2931_v6 = vadd.f32 %v890_v54, %v858_v34 }
 0x1e0   :  { %v837_v46 = vsel %vm836_vm14, %v2215_v40, %v833_v45 }
 0x1e1   :  { %v842_v48 = vsel %vm839_vm15, %v841_v43, %v837_v46  ;;  %1619 = vmatpush.bf16.msrb.mxu1 %v2113_v12  ;;  %v2956_v46 = vld [vmem:[%s3197_s4 + $0x1] ss:$0 sm:$0xff] }
 0x1e2   :  { %v875_v62 = vsub.f32 1.0, %v842_v48  ;;  %v859_v61 = vmul.f32 %v842_v48, %v422_v10 }
 0x1e4   :  { %v891_v53 = vmul.f32 %v875_v62, %v281_v39 }
 0x1e5   :  { %1620 = vmatpush.bf16.msrb.mxu1 %v2112_v57 }
 0x1e6   :  { %v2933_v9 = vadd.f32 %v891_v53, %v859_v61 }
 0x1e8   :  { %v915_v15 = vpack.c.bf16 %v2933_v9, %v2931_v6 }
 0x1e9   :  { %1621 = vmatpush.bf16.msrb.mxu1 %v2111_v55 }
 0x1ea   :  { %1029 = vmatmul.bf16.gmra.mxu3 %v915_v15  ;;  %1164 = vmatmul.bf16.gmra.mxu0 %v915_v15 }
 0x1f7   :  { %v1130_v37 = vpop.f32.mrf.mxu0 }
 0x1f8   :  { %v1131_v38 = vadd.f32 %v2940_v35, %v1130_v37 }
 0x1fa   :  { %v2023_v39 = vmul.f32 -1.442695, %v1131_v38 }
 0x1fc   :  { %2216 = vpow2.f32 %v2023_v39 }
 0x1fd   :  { %v995_v51 = vpop.f32.mrf.mxu3 }
 0x1fe   :  { %v996_v38 = vadd.f32 %v2956_v46, %v995_v51 }
 0x1ff   :  { %v1132_v20 = vpop.f32.mrf.mxu0 }
 0x200   :  { %v1133_v16 = vadd.f32 %v2940_v35, %v1132_v20  ;;  %v1035_v51 = vmax.f32 %v996_v38, 0.0 }
 0x202   :  { %v2217_v2 = vpop.eup %2216  ;;  %v2024_v21 = vmul.f32 -1.442695, %v1133_v16 }
 0x203   :  { %v1218_v44 = vadd.f32 1.0, %v2217_v2 }
 0x204   :  { %2218 = vpow2.f32 %v2024_v21 }
 0x205   :  { %2220 = vrcp.f32 %v1218_v44  ;;  %v997_v18 = vpop.f32.mrf.mxu3  ;;  %v1245_v17 = vand.u32 2147483648, %v1218_v44  ;;  %vm1239_vm1 = vweird.f32 %v1218_v44  ;;  %v1243_v45 = vand.u32 2147483647, %v1218_v44 }
 0x206   :  { %v998_v39 = vadd.f32 %v2956_v46, %v997_v18 }
 0x207   :  { %v1135_v11 = vpop.f32.mrf.mxu0  ;;  %v1246_v59 = vor.u32 1.1754944e-38, %v1245_v17  ;;  %vm1244_vm4 = vcmp.eq.f32.partialorder %v1243_v45, 8.507059e+37 }
 0x208   :  { %v1136_v24 = vadd.f32 %v2940_v35, %v1135_v11 }
 0x20a   :  { %v2219_v4 = vpop.eup %2218  ;;  %v2025_v56 = vmul.f32 -1.442695, %v1136_v24  ;;  %v1036_v24 = vmax.f32 %v998_v39, 0.0 }
 0x20b   :  { %v2221_v58 = vpop.eup %2220  ;;  %v1219_v52 = vadd.f32 1.0, %v2219_v4 }
 0x20c   :  { %v1235_v40 = vmul.f32 %v2221_v58, %v1218_v44  ;;  %2222 = vpow2.f32 %v2025_v56  ;;  %vm1240_vm0 = vweird.f32 %v2221_v58 }
 0x20d   :  { %2224 = vrcp.f32 %v1219_v52  ;;  %v2945_v0 = vpop.f32.mrf.mxu3  ;;  %vm1241_vm2 = vmor %vm1239_vm1, %vm1240_vm0  ;;  %v1260_v10 = vand.u32 2147483648, %v1219_v52  ;;  %v1258_v34 = vand.u32 2147483647, %v1219_v52  ;;  %vm1254_vm5 = vweird.f32 %v1219_v52 }
 0x20e   :  { %v1236_v22 = vsub.f32 1.0, %v1235_v40 }
 0x20f   :  { %v1137_v27 = vpop.f32.mrf.mxu0  ;;  %v1261_v12 = vor.u32 1.1754944e-38, %v1260_v10  ;;  %vm1259_vm7 = vcmp.eq.f32.partialorder %v1258_v34, 8.507059e+37 }
 0x210   :  { %v1237_v3 = vmul.f32 %v2221_v58, %v1236_v22  ;;  %v1138_v28 = vadd.f32 %v2940_v35, %v1137_v27 }
 0x212   :  { %v2223_v31 = vpop.eup %2222  ;;  %v2026_v19 = vmul.f32 -1.442695, %v1138_v28  ;;  %v1238_v14 = vadd.f32 %v2221_v58, %v1237_v3 }
 0x213   :  { %v2225_v49 = vpop.eup %2224  ;;  %v2948_v25 = vadd.f32 1.0, %v2223_v31 }
 0x214   :  { %v1250_v60 = vmul.f32 %v2225_v49, %v1219_v52  ;;  %2226 = vpow2.f32 %v2026_v19  ;;  %v1242_v48 = vsel %vm1241_vm2, %v2221_v58, %v1238_v14  ;;  %vm1255_vm3 = vweird.f32 %v2225_v49 }
 0x215   :  { %2228 = vrcp.f32 %v2948_v25  ;;  %v2951_v42 = vpop.f32.mrf.mxu3  ;;  %v1247_v15 = vsel %vm1244_vm4, %v1246_v59, %v1242_v48  ;;  %vm1256_vm6 = vmor %vm1254_vm5, %vm1255_vm3  ;;  %v1275_v3 = vand.u32 2147483648, %v2948_v25  ;;  %vm1269_vm9 = vweird.f32 %v2948_v25 }
 0x216   :  { %v1251_v43 = vsub.f32 1.0, %v1250_v60  ;;  %v1490_v2 = vsub.f32 1.0, %v1247_v15  ;;  %v1474_v27 = vmul.f32 %v1247_v15, %v1035_v51  ;;  %v1273_v60 = vand.u32 2147483647, %v2948_v25 }
 0x217   :  { %v1140_v62 = vpop.f32.mrf.mxu0  ;;  %v1276_v48 = vor.u32 1.1754944e-38, %v1275_v3  ;;  %v1003_v38 = vadd.f32 %v2956_v46, %v2951_v42 }
 0x218   :  { %v1252_v54 = vmul.f32 %v2225_v49, %v1251_v43  ;;  %v1141_v61 = vadd.f32 %v2940_v35, %v1140_v62  ;;  %v1506_v52 = vmul.f32 %v1490_v2, %v2747_v33  ;;  %vm1274_vm12 = vcmp.eq.f32.partialorder %v1273_v60, 8.507059e+37 }
 0x21a   :  { %v2227_v53 = vpop.eup %2226  ;;  %v1253_v36 = vadd.f32 %v2225_v49, %v1252_v54  ;;  %v2027_v37 = vmul.f32 -1.442695, %v1141_v61 }
 0x21b   :  { %v2229_v7 = vpop.eup %2228  ;;  %v1221_v20 = vadd.f32 1.0, %v2227_v53 }
 0x21c   :  { %v1257_v57 = vsel %vm1256_vm6, %v2225_v49, %v1253_v36  ;;  %v1265_v16 = vmul.f32 %v2229_v7, %v2948_v25  ;;  %2230 = vpow2.f32 %v2027_v37  ;;  %vm1270_vm8 = vweird.f32 %v2229_v7 }
 0x21d   :  { %v1262_v21 = vsel %vm1259_vm7, %v1261_v12, %v1257_v57  ;;  %2232 = vrcp.f32 %v1221_v20  ;;  %v2962_v44 = vpop.f32.mrf.mxu3  ;;  %vm1271_vm10 = vmor %vm1269_vm9, %vm1270_vm8  ;;  %v1290_v59 = vand.u32 2147483648, %v1221_v20  ;;  %v1288_v34 = vand.u32 2147483647, %v1221_v20 }
 0x21e   :  { %v1491_v55 = vsub.f32 1.0, %v1262_v21  ;;  %v1266_v11 = vsub.f32 1.0, %v1265_v16  ;;  %v1475_v40 = vmul.f32 %v1262_v21, %v1036_v24  ;;  %vm1284_vm13 = vweird.f32 %v1221_v20 }
 0x21f   :  { %v1142_v4 = vpop.f32.mrf.mxu0  ;;  %v1291_v39 = vor.u32 1.1754944e-38, %v1290_v59  ;;  %vm1289_vm15 = vcmp.eq.f32.partialorder %v1288_v34, 8.507059e+37  ;;  %v1038_v24 = vmax.f32 %v1003_v38, 0.0 }
 0x220   :  { %v1507_v18 = vmul.f32 %v1491_v55, %v2749_v50  ;;  %v1267_v56 = vmul.f32 %v2229_v7, %v1266_v11  ;;  %v1143_v58 = vadd.f32 %v2940_v35, %v1142_v4  ;;  %v1522_v50 = vadd.f32 %v1506_v52, %v1474_v27 }
 0x222   :  { %v2231_v22 = vpop.eup %2230  ;;  %v2028_v28 = vmul.f32 -1.442695, %v1143_v58  ;;  %v1523_v19 = vadd.f32 %v1507_v18, %v1475_v40  ;;  %v1268_v49 = vadd.f32 %v2229_v7, %v1267_v56 }
 0x223   :  { %v2233_v31 = vpop.eup %2232  ;;  %v2968_v14 = vadd.f32 1.0, %v2231_v22 }
 0x224   :  { %v1280_v17 = vmul.f32 %v2233_v31, %v1221_v20  ;;  %2234 = vpow2.f32 %v2028_v28  ;;  %v1272_v43 = vsel %vm1271_vm10, %v2229_v7, %v1268_v49  ;;  %v1538_v10 = vpack.c.bf16 %v1523_v19, %v1522_v50 }
 0x225   :  { %2236 = vrcp.f32 %v2968_v14  ;;  %v2973_v33 = vpop.f32.mrf.mxu3  ;;  %vm1285_vm11 = vweird.f32 %v2233_v31  ;;  %v1277_v25 = vsel %vm1274_vm12, %v1276_v48, %v1272_v43  ;;  %v1001_v7 = vadd.f32 %v2956_v46, %v2945_v0 }
 0x226   :  { %v1281_v45 = vsub.f32 1.0, %v1280_v17  ;;  %1622 = vmatmul.bf16.vlgmr.msrb.gmra.mxu1 %v1538_v10  ;;  %vm1286_vm14 = vmor %vm1284_vm13, %vm1285_vm11  ;;  %v1492_v2 = vsub.f32 1.0, %v1277_v25  ;;  %v1305_v22 = vand.u32 2147483648, %v2968_v14  ;;  %vm1299_vm1 = vweird.f32 %v2968_v14 }
 0x227   :  { %v1145_v62 = vpop.f32.mrf.mxu0  ;;  %v1037_v4 = vmax.f32 %v1001_v7, 0.0 }
 0x228   :  { %v1282_v54 = vmul.f32 %v2233_v31, %v1281_v45  ;;  %v1146_v61 = vadd.f32 %v2940_v35, %v1145_v62  ;;  %v1508_v58 = vmul.f32 %v1492_v2, %v2779_v1  ;;  %v1306_v45 = vor.u32 1.1754944e-38, %v1305_v22 }
 0x229   :  { %v1476_v40 = vmul.f32 %v1277_v25, %v1037_v4 }
 0x22a   :  { %v2235_v53 = vpop.eup %2234  ;;  %v1283_v15 = vadd.f32 %v2233_v31, %v1282_v54  ;;  %v2029_v36 = vmul.f32 -1.442695, %v1146_v61 }
 0x22b   :  { %v2237_v37 = vpop.eup %2236  ;;  %v1223_v12 = vadd.f32 1.0, %v2235_v53  ;;  %v1524_v1 = vadd.f32 %v1508_v58, %v1476_v40 }
 0x22c   :  { %v1287_v57 = vsel %vm1286_vm14, %v2233_v31, %v1283_v15  ;;  %v1295_v16 = vmul.f32 %v2237_v37, %v2968_v14  ;;  %2238 = vpow2.f32 %v2029_v36  ;;  %vm1300_vm0 = vweird.f32 %v2237_v37 }
 0x22d   :  { %v1292_v21 = vsel %vm1289_vm15, %v1291_v39, %v1287_v57  ;;  %2240 = vrcp.f32 %v1223_v12  ;;  %v2981_v20 = vpop.f32.mrf.mxu3  ;;  %vm2992_vm2 = vmor %vm1299_vm1, %vm1300_vm0  ;;  %v1320_v43 = vand.u32 2147483648, %v1223_v12  ;;  %vm1314_vm5 = vweird.f32 %v1223_v12 }
 0x22e   :  { %v1493_v55 = vsub.f32 1.0, %v1292_v21  ;;  %v1296_v11 = vsub.f32 1.0, %v1295_v16  ;;  %v1477_v56 = vmul.f32 %v1292_v21, %v1038_v24  ;;  %v1006_v36 = vadd.f32 %v2956_v46, %v2962_v44 }
 0x22f   :  { %v1147_v0 = vpop.f32.mrf.mxu0  ;;  %v1321_v7 = vor.u32 1.1754944e-38, %v1320_v43 }
 0x230   :  { %v1297_v51 = vmul.f32 %v2237_v37, %v1296_v11  ;;  %v1148_v42 = vadd.f32 %v2940_v35, %v1147_v0  ;;  %v1509_v18 = vmul.f32 %v1493_v55, %v2781_v47  ;;  %v1303_v47 = vand.u32 2147483647, %v2968_v14 }
 0x231   :  { %v1318_v14 = vand.u32 2147483647, %v1223_v12  ;;  %v1039_v24 = vmax.f32 %v1006_v36, 0.0 }
 0x232   :  { %v2239_v52 = vpop.eup %2238  ;;  %v2030_v27 = vmul.f32 -1.442695, %v1148_v42  ;;  %v1298_v28 = vadd.f32 %v2237_v37, %v1297_v51  ;;  %v1525_v19 = vadd.f32 %v1509_v18, %v1477_v56  ;;  %vm1304_vm4 = vcmp.eq.f32.partialorder %v1303_v47, 8.507059e+37 }
 0x233   :  { %v2241_v3 = vpop.eup %2240  ;;  %v2987_v31 = vadd.f32 1.0, %v2239_v52  ;;  %vm1319_vm7 = vcmp.eq.f32.partialorder %v1318_v14, 8.507059e+37 }
 0x234   :  { %v1310_v49 = vmul.f32 %v2241_v3, %v1223_v12  ;;  %2242 = vpow2.f32 %v2030_v27  ;;  %v1302_v60 = vsel %vm2992_vm2, %v2237_v37, %v1298_v28  ;;  %v1539_v59 = vpack.c.bf16 %v1525_v19, %v1524_v1 }
 0x235   :  { %2244 = vrcp.f32 %v2987_v31  ;;  %v2998_v48 = vpop.f32.mrf.mxu3  ;;  %vm1315_vm3 = vweird.f32 %v2241_v3  ;;  %v1307_v61 = vsel %vm1304_vm4, %v1306_v45, %v1302_v60  ;;  %v1008_v37 = vadd.f32 %v2956_v46, %v2973_v33 }
 0x236   :  { %v1311_v50 = vsub.f32 1.0, %v1310_v49  ;;  %1627 = vmatmul.bf16.gmra.mxu1 %v1539_v59  ;;  %vm1316_vm6 = vmor %vm1314_vm5, %vm1315_vm3  ;;  %v1494_v16 = vsub.f32 1.0, %v1307_v61  ;;  %v1478_v56 = vmul.f32 %v1307_v61, %v1039_v24  ;;  %v1335_v58 = vand.u32 2147483648, %v2987_v31 }
 0x237   :  { %v1150_v10 = vpop.f32.mrf.mxu0  ;;  %v1040_v55 = vmax.f32 %v1008_v37, 0.0  ;;  %vm1329_vm9 = vweird.f32 %v2987_v31 }
 0x238   :  { %v1312_v62 = vmul.f32 %v2241_v3, %v1311_v50  ;;  %v1151_v54 = vadd.f32 %v2940_v35, %v1150_v10  ;;  %v1510_v42 = vmul.f32 %v1494_v16, %v2811_v41  ;;  %v1336_v47 = vor.u32 1.1754944e-38, %v1335_v58 }
 0x23a   :  { %v2243_v34 = vpop.eup %2242  ;;  %v1313_v53 = vadd.f32 %v2241_v3, %v1312_v62  ;;  %v2031_v25 = vmul.f32 -1.442695, %v1151_v54  ;;  %v1526_v41 = vadd.f32 %v1510_v42, %v1478_v56  ;;  %v1011_v54 = vadd.f32 %v2956_v46, %v2981_v20 }
 0x23b   :  { %v2245_v15 = vpop.eup %2244  ;;  %v1225_v38 = vadd.f32 1.0, %v2243_v34  ;;  %v1013_v34 = vadd.f32 %v2956_v46, %v2998_v48 }
 0x23c   :  { %v1317_v39 = vsel %vm1316_vm6, %v2241_v3, %v1313_v53  ;;  %v1325_v57 = vmul.f32 %v2245_v15, %v2987_v31  ;;  %2246 = vpow2.f32 %v2031_v25  ;;  %vm1330_vm8 = vweird.f32 %v2245_v15 }
 0x23d   :  { %v1322_v2 = vsel %vm1319_vm7, %v1321_v7, %v1317_v39  ;;  %2248 = vrcp.f32 %v1225_v38  ;;  %v3008_v51 = vpop.f32.mrf.mxu3  ;;  %vm1331_vm10 = vmor %vm1329_vm9, %vm1330_vm8  ;;  %v1350_v1 = vand.u32 2147483648, %v1225_v38  ;;  %v1348_v45 = vand.u32 2147483647, %v1225_v38 }
 0x23e   :  { %v1495_v12 = vsub.f32 1.0, %v1322_v2  ;;  %v1326_v21 = vsub.f32 1.0, %v1325_v57  ;;  %v1479_v4 = vmul.f32 %v1322_v2, %v1040_v55  ;;  %vm1344_vm13 = vweird.f32 %v1225_v38 }
 0x23f   :  { %v1152_v11 = vpop.f32.mrf.mxu0  ;;  %v1351_v61 = vor.u32 1.1754944e-38, %v1350_v1  ;;  %vm1349_vm15 = vcmp.eq.f32.partialorder %v1348_v45, 8.507059e+37  ;;  %v1042_v57 = vmax.f32 %v1013_v34, 0.0  ;;  %v1041_v20 = vmax.f32 %v1011_v54, 0.0 }
 0x240   :  { %v1327_v44 = vmul.f32 %v2245_v15, %v1326_v21  ;;  %v1153_v0 = vadd.f32 %v2940_v35, %v1152_v11  ;;  %v1511_v33 = vmul.f32 %v1495_v12, %v2813_v5  ;;  %v1333_v5 = vand.u32 2147483647, %v2987_v31 }
 0x242   :  { %v2247_v18 = vpop.eup %2246  ;;  %v2032_v52 = vmul.f32 -1.442695, %v1153_v0  ;;  %v1328_v22 = vadd.f32 %v2245_v15, %v1327_v44  ;;  %v1527_v3 = vadd.f32 %v1511_v33, %v1479_v4  ;;  %vm1334_vm12 = vcmp.eq.f32.partialorder %v1333_v5, 8.507059e+37 }
 0x243   :  { %v2249_v40 = vpop.eup %2248  ;;  %v3012_v27 = vadd.f32 1.0, %v2247_v18 }
 0x244   :  { %v1340_v28 = vmul.f32 %v2249_v40, %v1225_v38  ;;  %2250 = vpow2.f32 %v2032_v52  ;;  %v1332_v49 = vsel %vm1331_vm10, %v2245_v15, %v1328_v22  ;;  %v1540_v17 = vpack.c.bf16 %v1527_v3, %v1526_v41 }
 0x245   :  { %2252 = vrcp.f32 %v3012_v27  ;;  %vm1345_vm11 = vweird.f32 %v2249_v40  ;;  %v1337_v10 = vsel %vm1334_vm12, %v1336_v47, %v1332_v49  ;;  %v1017_v25 = vpop.f32.mrf.mxu3  ;;  %v1365_v44 = vand.u32 2147483648, %v3012_v27 }
 0x246   :  { %v1341_v19 = vsub.f32 1.0, %v1340_v28  ;;  %1632 = vmatmul.bf16.gmra.mxu1 %v1540_v17  ;;  %vm1346_vm14 = vmor %vm1344_vm13, %vm1345_vm11  ;;  %v1496_v37 = vsub.f32 1.0, %v1337_v10  ;;  %v1480_v24 = vmul.f32 %v1337_v10, %v1041_v20  ;;  %vm1359_vm1 = vweird.f32 %v3012_v27 }
 0x247   :  { %v1155_v50 = vpop.f32.mrf.mxu0  ;;  %v1366_v22 = vor.u32 1.1754944e-38, %v1365_v44  ;;  %v1018_v45 = vadd.f32 %v2956_v46, %v1017_v25 }
 0x248   :  { %v1342_v60 = vmul.f32 %v2249_v40, %v1341_v19  ;;  %v1156_v43 = vadd.f32 %v2940_v35, %v1155_v50  ;;  %v1512_v55 = vmul.f32 %v1496_v37, %v2840_v23 }
 0x24a   :  { %v2251_v59 = vpop.eup %2250  ;;  %v1343_v31 = vadd.f32 %v2249_v40, %v1342_v60  ;;  %v2033_v62 = vmul.f32 -1.442695, %v1156_v43  ;;  %v1528_v58 = vadd.f32 %v1512_v55, %v1480_v24  ;;  %v1016_v60 = vadd.f32 %v2956_v46, %v3008_v51 }
 0x24b   :  { %v2253_v14 = vpop.eup %2252  ;;  %v1227_v53 = vadd.f32 1.0, %v2251_v59 }
 0x24c   :  { %v1347_v15 = vsel %vm1346_vm14, %v2249_v40, %v1343_v31  ;;  %v1355_v36 = vmul.f32 %v2253_v14, %v3012_v27  ;;  %2254 = vpow2.f32 %v2033_v62  ;;  %vm1360_vm0 = vweird.f32 %v2253_v14 }
 0x24d   :  { %v1352_v7 = vsel %vm1349_vm15, %v1351_v61, %v1347_v15  ;;  %2256 = vrcp.f32 %v1227_v53  ;;  %v3032_v23 = vpop.f32.mrf.mxu3  ;;  %vm1361_vm2 = vmor %vm1359_vm1, %vm1360_vm0  ;;  %v1380_v3 = vand.u32 2147483648, %v1227_v53  ;;  %v1378_v19 = vand.u32 2147483647, %v1227_v53 }
 0x24e   :  { %v1497_v38 = vsub.f32 1.0, %v1352_v7  ;;  %v1356_v39 = vsub.f32 1.0, %v1355_v36  ;;  %v1481_v21 = vmul.f32 %v1352_v7, %v1042_v57  ;;  %vm1374_vm5 = vweird.f32 %v1227_v53 }
 0x24f   :  { %v1157_v16 = vpop.f32.mrf.mxu0  ;;  %v1381_v43 = vor.u32 1.1754944e-38, %v1380_v3  ;;  %vm1379_vm7 = vcmp.eq.f32.partialorder %v1378_v19, 8.507059e+37  ;;  %v1044_v61 = vmax.f32 %v1018_v45, 0.0  ;;  %v1043_v36 = vmax.f32 %v1016_v60, 0.0 }
 0x250   :  { %v1357_v2 = vmul.f32 %v2253_v14, %v1356_v39  ;;  %v1158_v48 = vadd.f32 %v2940_v35, %v1157_v16  ;;  %v1513_v12 = vmul.f32 %v1497_v38, %v2842_v29  ;;  %v1363_v29 = vand.u32 2147483647, %v3012_v27 }
 0x252   :  { %v2255_v11 = vpop.eup %2254  ;;  %v2034_v0 = vmul.f32 -1.442695, %v1158_v48  ;;  %v1358_v4 = vadd.f32 %v2253_v14, %v1357_v2  ;;  %v1529_v18 = vadd.f32 %v1513_v12, %v1481_v21  ;;  %vm1364_vm4 = vcmp.eq.f32.partialorder %v1363_v29, 8.507059e+37 }
 0x253   :  { %v2257_v33 = vpop.eup %2256  ;;  %v3027_v42 = vadd.f32 1.0, %v2255_v11 }
 0x254   :  { %v1370_v56 = vmul.f32 %v2257_v33, %v1227_v53  ;;  %2258 = vpow2.f32 %v2034_v0  ;;  %v1362_v40 = vsel %vm1361_vm2, %v2253_v14, %v1358_v4  ;;  %v1541_v28 = vpack.c.bf16 %v1529_v18, %v1528_v58 }
 0x255   :  { %2260 = vrcp.f32 %v3027_v42  ;;  %vm1375_vm3 = vweird.f32 %v2257_v33  ;;  %v1367_v47 = vsel %vm1364_vm4, %v1366_v22, %v1362_v40  ;;  %v1022_v53 = vpop.f32.mrf.mxu3  ;;  %v1395_v16 = vand.u32 2147483648, %v3027_v42 }
 0x256   :  { %v1371_v52 = vsub.f32 1.0, %v1370_v56  ;;  %1637 = vmatmul.bf16.gmra.mxu1 %v1541_v28  ;;  %vm1376_vm6 = vmor %vm1374_vm5, %vm1375_vm3  ;;  %v1498_v62 = vsub.f32 1.0, %v1367_v47  ;;  %v1482_v57 = vmul.f32 %v1367_v47, %v1043_v36  ;;  %vm1389_vm9 = vweird.f32 %v3027_v42 }
 0x257   :  { %v1160_v5 = vpop.f32.mrf.mxu0  ;;  %v1396_v0 = vor.u32 1.1754944e-38, %v1395_v16  ;;  %v1021_v47 = vadd.f32 %v2956_v46, %v3032_v23 }
 0x258   :  { %v1372_v41 = vmul.f32 %v2257_v33, %v1371_v52  ;;  %v1161_v49 = vadd.f32 %v2940_v35, %v1160_v5  ;;  %v1514_v38 = vmul.f32 %v1498_v62, %v2872_v63  ;;  %v1023_v5 = vadd.f32 %v2956_v46, %v1022_v53 }
 0x259   :  { %v1045_v62 = vmax.f32 %v1021_v47, 0.0 }
 0x25a   :  { %v2259_v27 = vpop.eup %2258  ;;  %v1373_v1 = vadd.f32 %v2257_v33, %v1372_v41  ;;  %v2035_v17 = vmul.f32 -1.442695, %v1161_v49  ;;  %v1530_v63 = vadd.f32 %v1514_v38, %v1482_v57  ;;  %v1046_v45 = vmax.f32 %v1023_v5, 0.0 }
 0x25b   :  { %v2261_v50 = vpop.eup %2260  ;;  %v1229_v59 = vadd.f32 1.0, %v2259_v27 }
 0x25c   :  { %v1377_v10 = vsel %vm1376_vm6, %v2257_v33, %v1373_v1  ;;  %v1385_v31 = vmul.f32 %v2261_v50, %v3027_v42  ;;  %2262 = vpow2.f32 %v2035_v17  ;;  %vm1390_vm8 = vweird.f32 %v2261_v50 }
 0x25d   :  { %v1382_v14 = vsel %vm1379_vm7, %v1381_v43, %v1377_v10  ;;  %2264 = vrcp.f32 %v1229_v59  ;;  %vm3048_vm10 = vmor %vm1389_vm9, %vm1390_vm8  ;;  %v1410_v33 = vand.u32 2147483648, %v1229_v59  ;;  %v1408_v29 = vand.u32 2147483647, %v1229_v59  ;;  %v3055_v58 = vpop.f32.mrf.mxu3 }
 0x25e   :  { %v1499_v54 = vsub.f32 1.0, %v1382_v14  ;;  %v1386_v34 = vsub.f32 1.0, %v1385_v31  ;;  %v1483_v7 = vmul.f32 %v1382_v14, %v1044_v61  ;;  %vm1404_vm13 = vweird.f32 %v1229_v59 }
 0x25f   :  { %v1162_v15 = vpop.f32.mrf.mxu0  ;;  %v1411_v41 = vor.u32 1.1754944e-38, %v1410_v33  ;;  %vm1409_vm15 = vcmp.eq.f32.partialorder %v1408_v29, 8.507059e+37 }
 0x260   :  { %v1387_v51 = vmul.f32 %v2261_v50, %v1386_v34  ;;  %v1163_v25 = vadd.f32 %v2940_v35, %v1162_v15  ;;  %v1515_v37 = vmul.f32 %v1499_v54, %v2874_v32  ;;  %v1393_v32 = vand.u32 2147483647, %v3027_v42 }
 0x262   :  { %v2263_v39 = vpop.eup %2262  ;;  %v2036_v20 = vmul.f32 -1.442695, %v1163_v25  ;;  %v1388_v48 = vadd.f32 %v2261_v50, %v1387_v51  ;;  %v1531_v21 = vadd.f32 %v1515_v37, %v1483_v7  ;;  %vm1394_vm12 = vcmp.eq.f32.partialorder %v1393_v32, 8.507059e+37 }
 0x263   :  { %v2265_v2 = vpop.eup %2264  ;;  %v3043_v12 = vadd.f32 1.0, %v2263_v39 }
 0x264   :  { %v1400_v55 = vmul.f32 %v2265_v2, %v1229_v59  ;;  %2266 = vpow2.f32 %v2036_v20  ;;  %v1392_v44 = vsel %vm3048_vm10, %v2261_v50, %v1388_v48  ;;  %v1542_v4 = vpack.c.bf16 %v1531_v21, %v1530_v63 }
 0x265   :  { %2268 = vrcp.f32 %v3043_v12  ;;  %vm1405_vm11 = vweird.f32 %v2265_v2  ;;  %v1397_v40 = vsel %vm1394_vm12, %v1396_v0, %v1392_v44  ;;  %vm1419_vm1 = vweird.f32 %v3043_v12  ;;  %v1027_v25 = vpop.f32.mrf.mxu3 }
 0x266   :  { %v1401_v24 = vsub.f32 1.0, %v1400_v55  ;;  %1642 = vmatmul.bf16.gmra.mxu1 %v1542_v4  ;;  %vm1406_vm14 = vmor %vm1404_vm13, %vm1405_vm11  ;;  %v1500_v1 = vsub.f32 1.0, %v1397_v40  ;;  %v1425_v23 = vand.u32 2147483648, %v3043_v12  ;;  %v1484_v36 = vmul.f32 %v1397_v40, %v1045_v62 }
 0x267   :  { %v1165_v18 = vpop.f32.mrf.mxu0  ;;  %v1423_v51 = vand.u32 2147483647, %v3043_v12  ;;  %v1028_v21 = vadd.f32 %v2956_v46, %v1027_v25  ;;  %v1026_v63 = vadd.f32 %v2956_v46, %v3055_v58 }
 0x268   :  { %v1402_v56 = vmul.f32 %v2265_v2, %v1401_v24  ;;  %v1166_v42 = vadd.f32 %v2940_v35, %v1165_v18  ;;  %v1516_v54 = vmul.f32 %v1500_v1, %v2902_v8  ;;  %v1426_v38 = vor.u32 1.1754944e-38, %v1425_v23 }
 0x269   :  { %vm1424_vm3 = vcmp.eq.f32.partialorder %v1423_v51, 8.507059e+37 }
 0x26a   :  { %v2267_v52 = vpop.eup %2266  ;;  %v1403_v22 = vadd.f32 %v2265_v2, %v1402_v56  ;;  %v2037_v3 = vmul.f32 -1.442695, %v1166_v42  ;;  %v1532_v8 = vadd.f32 %v1516_v54, %v1484_v36  ;;  %v1048_v56 = vmax.f32 %v1028_v21, 0.0 }
 0x26b   :  { %v2269_v28 = vpop.eup %2268  ;;  %v1231_v19 = vadd.f32 1.0, %v2267_v52  ;;  %v1047_v52 = vmax.f32 %v1026_v63, 0.0 }
 0x26c   :  { %v1407_v49 = vsel %vm1406_vm14, %v2265_v2, %v1403_v22  ;;  %v1415_v27 = vmul.f32 %v2269_v28, %v3043_v12  ;;  %2270 = vpow2.f32 %v2037_v3  ;;  %vm1420_vm0 = vweird.f32 %v2269_v28 }
 0x26d   :  { %v1412_v17 = vsel %vm1409_vm15, %v1411_v41, %v1407_v49  ;;  %2272 = vrcp.f32 %v1231_v19  ;;  %vm1421_vm2 = vmor %vm1419_vm1, %vm1420_vm0  ;;  %v1440_v57 = vand.u32 2147483648, %v1231_v19  ;;  %v1438_v48 = vand.u32 2147483647, %v1231_v19  ;;  %v1030_v18 = vpop.f32.mrf.mxu3 }
 0x26e   :  { %v1501_v50 = vsub.f32 1.0, %v1412_v17  ;;  %v1416_v60 = vsub.f32 1.0, %v1415_v27  ;;  %v1485_v14 = vmul.f32 %v1412_v17, %v1046_v45  ;;  %vm1434_vm5 = vweird.f32 %v1231_v19 }
 0x26f   :  { %v1167_v43 = vpop.f32.mrf.mxu0  ;;  %v1441_v24 = vor.u32 1.1754944e-38, %v1440_v57  ;;  %vm1439_vm7 = vcmp.eq.f32.partialorder %v1438_v48, 8.507059e+37 }
 0x270   :  { %v1417_v59 = vmul.f32 %v2269_v28, %v1416_v60  ;;  %v1168_v10 = vadd.f32 %v2940_v35, %v1167_v43  ;;  %v1517_v31 = vmul.f32 %v1501_v50, %v2904_v13 }
 0x272   :  { %v2271_v34 = vpop.eup %2270  ;;  %v1418_v61 = vadd.f32 %v2269_v28, %v1417_v59  ;;  %v2038_v53 = vmul.f32 -1.442695, %v1168_v10  ;;  %v1533_v37 = vadd.f32 %v1517_v31, %v1485_v14  ;;  %v1031_v14 = vadd.f32 %v2956_v46, %v1030_v18 }
 0x273   :  { %v2273_v15 = vpop.eup %2272  ;;  %v1232_v35 = vadd.f32 1.0, %v2271_v34 }
 0x274   :  { %v1430_v13 = vmul.f32 %v2273_v15, %v1231_v19  ;;  %2274 = vpow2.f32 %v2038_v53  ;;  %v1422_v7 = vsel %vm1421_vm2, %v2269_v28, %v1418_v61  ;;  %v1543_v16 = vpack.c.bf16 %v1533_v37, %v1532_v8 }
 0x275   :  { %2276 = vrcp.f32 %v1232_v35  ;;  %v1427_v20 = vsel %vm1424_vm3, %v1426_v38, %v1422_v7  ;;  %vm1435_vm4 = vweird.f32 %v2273_v15  ;;  %v1455_v41 = vand.u32 2147483648, %v1232_v35 }
 0x276   :  { %v1431_v39 = vsub.f32 1.0, %v1430_v13  ;;  %1647 = vmatmul.bf16.gmra.mxu1 %v1543_v16  ;;  %v1502_v11 = vsub.f32 1.0, %v1427_v20  ;;  %vm1436_vm6 = vmor %vm1434_vm5, %vm1435_vm4  ;;  %v1486_v28 = vmul.f32 %v1427_v20, %v1047_v52  ;;  %vm1449_vm9 = vweird.f32 %v1232_v35 }
 0x277   :  { %v1453_v27 = vand.u32 2147483647, %v1232_v35  ;;  %v1456_v60 = vor.u32 1.1754944e-38, %v1455_v41  ;;  %v1049_v36 = vmax.f32 %v1031_v14, 0.0 }
 0x278   :  { %v1432_v2 = vmul.f32 %v2273_v15, %v1431_v39  ;;  %v1518_v40 = vmul.f32 %v1502_v11, %v2919_v26  ;;  %v1032_v26 = vpop.f32.mrf.mxu3 }
 0x279   :  { %vm1454_vm11 = vcmp.eq.f32.partialorder %v1453_v27, 8.507059e+37  ;;  %v1033_v31 = vadd.f32 %v2956_v46, %v1032_v26  ;;  %v2151_v46 = vld [vmem:[%s3201_s8] ss:$0 sm:$0xff]  ;;  %s2532_s8 = smov [#allocation13]  }
 0x27a   :  { %v2275_v12 = vpop.eup %2274  ;;  %v1433_v55 = vadd.f32 %v2273_v15, %v1432_v2  ;;  %v1534_v47 = vadd.f32 %v1518_v40, %v1486_v28  ;;  %s1827_s3 = sshll.u32 %s2532_s8, 4  ;;  %s1828_s3 = int_to_ptr.vmem [resolvable:$true] %s1827_s3 }
 0x27b   :  { %v2277_v32 = vpop.eup %2276  ;;  %v1233_v44 = vadd.f32 1.0, %v2275_v12  ;;  %v1050_v53 = vmax.f32 %v1033_v31, 0.0 }
 0x27c   :  { %v1437_v0 = vsel %vm1436_vm6, %v2273_v15, %v1433_v55  ;;  %v1445_v33 = vmul.f32 %v2277_v32, %v1232_v35  ;;  %vm1450_vm8 = vweird.f32 %v2277_v32 }
 0x27d   :  { %v1442_v4 = vsel %vm1439_vm7, %v1441_v24, %v1437_v0  ;;  %2278 = vrcp.f32 %v1233_v44  ;;  %vm1451_vm10 = vmor %vm1449_vm9, %vm1450_vm8  ;;  %v1470_v43 = vand.u32 2147483648, %v1233_v44  ;;  %v1468_v10 = vand.u32 2147483647, %v1233_v44 }
 0x27e   :  { %v1503_v29 = vsub.f32 1.0, %v1442_v4  ;;  %v1446_v42 = vsub.f32 1.0, %v1445_v33  ;;  %v1487_v22 = vmul.f32 %v1442_v4, %v1048_v56  ;;  %vm1464_vm13 = vweird.f32 %v1233_v44 }
 0x27f   :  { %v1471_v34 = vor.u32 1.1754944e-38, %v1470_v43  ;;  %vm1469_vm15 = vcmp.eq.f32.partialorder %v1468_v10, 8.507059e+37 }
 0x280   :  { %v1447_v3 = vmul.f32 %v2277_v32, %v1446_v42  ;;  %v1519_v58 = vmul.f32 %v1503_v29, %v2921_v30 }
 0x282   :  { %v1448_v5 = vadd.f32 %v2277_v32, %v1447_v3  ;;  %v1535_v19 = vadd.f32 %v1519_v58, %v1487_v22 }
 0x283   :  { %v2279_v49 = vpop.eup %2278 }
 0x284   :  { %v1460_v1 = vmul.f32 %v2279_v49, %v1233_v44  ;;  %v1452_v17 = vsel %vm1451_vm10, %v2277_v32, %v1448_v5  ;;  %v1544_v50 = vpack.c.bf16 %v1535_v19, %v1534_v47  ;;  %vm1465_vm12 = vweird.f32 %v2279_v49 }
 0x285   :  { %v1457_v59 = vsel %vm1454_vm11, %v1456_v60, %v1452_v17  ;;  %vm1466_vm14 = vmor %vm1464_vm13, %vm1465_vm12 }
 0x286   :  { %v1461_v45 = vsub.f32 1.0, %v1460_v1  ;;  %1652 = vmatmul.bf16.gmra.mxu1 %v1544_v50  ;;  %v1504_v54 = vsub.f32 1.0, %v1457_v59  ;;  %v1488_v37 = vmul.f32 %v1457_v59, %v1049_v36 }
 0x288   :  { %v1462_v30 = vmul.f32 %v2279_v49, %v1461_v45  ;;  %v1520_v51 = vmul.f32 %v1504_v54, %v2931_v6 }
 0x28a   :  { %v1463_v62 = vadd.f32 %v2279_v49, %v1462_v30  ;;  %v1536_v7 = vadd.f32 %v1520_v51, %v1488_v37 }
 0x28c   :  { %v1467_v61 = vsel %vm1466_vm14, %v2279_v49, %v1463_v62 }
 0x28d   :  { %v1472_v23 = vsel %vm1469_vm15, %v1471_v34, %v1467_v61 }
 0x28e   :  { %v1505_v15 = vsub.f32 1.0, %v1472_v23  ;;  %v1489_v25 = vmul.f32 %v1472_v23, %v1050_v53 }
 0x290   :  { %v1521_v35 = vmul.f32 %v1505_v15, %v2933_v9 }
 0x292   :  { %v1537_v13 = vadd.f32 %v1521_v35, %v1489_v25 }
 0x294   :  { %v1545_v8 = vpack.c.bf16 %v1537_v13, %v1536_v7 }
 0x296   :  { %1657 = vmatmul.bf16.gmra.mxu1 %v1545_v8 }
 0x2a3   :  { %v1623_v38 = vpop.f32.mrf.mxu1 }
 0x2a4   :  { %v1624_v39 = vadd.f32 %v2151_v46, %v1623_v38 }
 0x2a6   :  { %1663 = vmax.xlane.f32.xlu0 %v1624_v39 }
 0x2ab   :  { %v1625_v57 = vpop.f32.mrf.mxu1 }
 0x2ac   :  { %v1626_v16 = vadd.f32 %v2151_v46, %v1625_v57 }
 0x2ae   :  { %1665 = vmax.xlane.f32.xlu0 %v1626_v16 }
 0x2b3   :  { %v1628_v20 = vpop.f32.mrf.mxu1 }
 0x2b4   :  { %v1629_v6 = vadd.f32 %v2151_v46, %v1628_v20 }
 0x2b6   :  { %1667 = vmax.xlane.f32.xlu1 %v1629_v6 }
 0x2bb   :  { %v1630_v2 = vpop.f32.mrf.mxu1 }
 0x2bc   :  { %v1631_v9 = vadd.f32 %v2151_v46, %v1630_v2 }
 0x2be   :  { %1669 = vmax.xlane.f32.xlu1 %v1631_v9 }
 0x2c3   :  { %v1633_v48 = vpop.f32.mrf.mxu1 }
 0x2c4   :  { %v1634_v12 = vadd.f32 %v2151_v46, %v1633_v48 }
 0x2c6   :  { %1671 = vmax.xlane.f32.xlu2 %v1634_v12 }
 0x2cb   :  { %v1635_v21 = vpop.f32.mrf.mxu1 }
 0x2cc   :  { %v3079_v55 = vadd.f32 %v2151_v46, %v1635_v21 }
 0x2ce   :  { %1673 = vmax.xlane.f32.xlu2 %v3079_v55 }
 0x2d3   :  { %v1638_v32 = vpop.f32.mrf.mxu1 }
 0x2d4   :  { %v3082_v63 = vadd.f32 %v2151_v46, %v1638_v32 }
 0x2d6   :  { %1675 = vmax.xlane.f32.xlu0 %v3082_v63 }
 0x2db   :  { %v1640_v11 = vpop.f32.mrf.mxu1 }
 0x2dc   :  { %v3085_v24 = vadd.f32 %v2151_v46, %v1640_v11 }
 0x2de   :  { %1677 = vmax.xlane.f32.xlu1 %v3085_v24 }
 0x2e3   :  { %v1643_v44 = vpop.f32.mrf.mxu1 }
 0x2e4   :  { %v3088_v0 = vadd.f32 %v2151_v46, %v1643_v44 }
 0x2e6   :  { %1679 = vmax.xlane.f32.xlu2 %v3088_v0 }
 0x2eb   :  { %v1645_v33 = vpop.f32.mrf.mxu1 }
 0x2ec   :  { %v3091_v4 = vadd.f32 %v2151_v46, %v1645_v33 }
 0x2ee   :  { %1681 = vmax.xlane.f32.xlu0 %v3091_v4 }
 0x2f3   :  { %v1648_v18 = vpop.f32.mrf.mxu1 }
 0x2f4   :  { %v3094_v56 = vadd.f32 %v2151_v46, %v1648_v18 }
 0x2f6   :  { %1683 = vmax.xlane.f32.xlu1 %v3094_v56 }
 0x2fb   :  { %v1650_v29 = vpop.f32.mrf.mxu1 }
 0x2fc   :  { %v3097_v42 = vadd.f32 %v2151_v46, %v1650_v29 }
 0x2fe   :  { %1685 = vmax.xlane.f32.xlu2 %v3097_v42 }
 0x303   :  { %v1653_v52 = vpop.f32.mrf.mxu1 }
 0x304   :  { %v3100_v40 = vadd.f32 %v2151_v46, %v1653_v52 }
 0x306   :  { %1687 = vmax.xlane.f32.xlu0 %v3100_v40 }
 0x30b   :  { %v1655_v22 = vpop.f32.mrf.mxu1 }
 0x30c   :  { %v3103_v3 = vadd.f32 %v2151_v46, %v1655_v22 }
 0x30e   :  { %1689 = vmax.xlane.f32.xlu1 %v3103_v3 }
 0x313   :  { %v1658_v58 = vpop.f32.mrf.mxu1 }
 0x314   :  { %v3106_v28 = vadd.f32 %v2151_v46, %v1658_v58 }
 0x316   :  { %1691 = vmax.xlane.f32.xlu2 %v3106_v28 }
 0x319   :  { %v1664_v5 = vpop.xlane.xlu0 %1663 }
 0x31a   :  { %v1695_v41 = vsub.f32 %v1624_v39, %v1664_v5 }
 0x31b   :  { %v1660_v19 = vpop.f32.mrf.mxu1 }
 0x31c   :  { %v1711_v49 = vmul.f32 1.442695, %v1695_v41  ;;  %v3109_v27 = vadd.f32 %v2151_v46, %v1660_v19 }
 0x31e   :  { %2280 = vpow2.f32 %v1711_v49  ;;  %1693 = vmax.xlane.f32.xlu0 %v3109_v27 }
 0x321   :  { %v1666_v47 = vpop.xlane.xlu0 %1665 }
 0x322   :  { %v1696_v1 = vsub.f32 %v1626_v16, %v1666_v47 }
 0x324   :  { %v3112_v17 = vpop.eup %2280  ;;  %v1713_v50 = vmul.f32 1.442695, %v1696_v1 }
 0x325   :  { %1743 = vadd.xlane.f32.xlu1 %v3112_v17 }
 0x326   :  { %2282 = vpow2.f32 %v1713_v50 }
 0x329   :  { %v1668_v60 = vpop.xlane.xlu1 %1667 }
 0x32a   :  { %v1697_v45 = vsub.f32 %v1629_v6, %v1668_v60 }
 0x32c   :  { %v3115_v26 = vpop.eup %2282  ;;  %v1715_v43 = vmul.f32 1.442695, %v1697_v45 }
 0x32d   :  { %1745 = vadd.xlane.f32.xlu2 %v3115_v26 }
 0x32e   :  { %2284 = vpow2.f32 %v1715_v43 }
 0x331   :  { %v1670_v59 = vpop.xlane.xlu1 %1669 }
 0x332   :  { %v1698_v30 = vsub.f32 %v1631_v9, %v1670_v59 }
 0x334   :  { %v3118_v10 = vpop.eup %2284  ;;  %v1717_v31 = vmul.f32 1.442695, %v1698_v30 }
 0x335   :  { %1747 = vadd.xlane.f32.xlu0 %v3118_v10 }
 0x336   :  { %2286 = vpow2.f32 %v1717_v31 }
 0x339   :  { %v1672_v62 = vpop.xlane.xlu2 %1671 }
 0x33a   :  { %v1699_v14 = vsub.f32 %v1634_v12, %v1672_v62 }
 0x33c   :  { %v3121_v54 = vpop.eup %2286  ;;  %v1719_v34 = vmul.f32 1.442695, %v1699_v14 }
 0x33d   :  { %1749 = vadd.xlane.f32.xlu1 %v3121_v54 }
 0x33e   :  { %2288 = vpow2.f32 %v1719_v34 }
 0x341   :  { %v1674_v61 = vpop.xlane.xlu2 %1673 }
 0x342   :  { %v1700_v23 = vsub.f32 %v3079_v55, %v1674_v61 }
 0x344   :  { %v3125_v53 = vpop.eup %2288  ;;  %v1721_v15 = vmul.f32 1.442695, %v1700_v23 }
 0x345   :  { %1751 = vadd.xlane.f32.xlu2 %v3125_v53 }
 0x346   :  { %2290 = vpow2.f32 %v1721_v15 }
 0x349   :  { %v1676_v36 = vpop.xlane.xlu0 %1675 }
 0x34a   :  { %v1701_v51 = vsub.f32 %v3082_v63, %v1676_v36 }
 0x34c   :  { %v3129_v25 = vpop.eup %2290  ;;  %v1723_v35 = vmul.f32 1.442695, %v1701_v51 }
 0x34d   :  { %1753 = vadd.xlane.f32.xlu0 %v3129_v25 }
 0x34e   :  { %2292 = vpow2.f32 %v1723_v35 }
 0x351   :  { %v1678_v37 = vpop.xlane.xlu1 %1677 }
 0x352   :  { %v1702_v13 = vsub.f32 %v3085_v24, %v1678_v37 }
 0x354   :  { %v3133_v7 = vpop.eup %2292  ;;  %v1725_v8 = vmul.f32 1.442695, %v1702_v13 }
 0x355   :  { %1755 = vadd.xlane.f32.xlu1 %v3133_v7 }
 0x356   :  { %2294 = vpow2.f32 %v1725_v8 }
 0x359   :  { %v1680_v46 = vpop.xlane.xlu2 %1679 }
 0x35a   :  { %v1703_v38 = vsub.f32 %v3088_v0, %v1680_v46 }
 0x35c   :  { %v3137_v39 = vpop.eup %2294  ;;  %v1727_v57 = vmul.f32 1.442695, %v1703_v38 }
 0x35d   :  { %1757 = vadd.xlane.f32.xlu2 %v3137_v39 }
 0x35e   :  { %2296 = vpow2.f32 %v1727_v57 }
 0x361   :  { %v1682_v16 = vpop.xlane.xlu0 %1681 }
 0x362   :  { %v1704_v20 = vsub.f32 %v3091_v4, %v1682_v16 }
 0x364   :  { %v3141_v6 = vpop.eup %2296  ;;  %v1729_v2 = vmul.f32 1.442695, %v1704_v20 }
 0x365   :  { %1759 = vadd.xlane.f32.xlu0 %v3141_v6 }
 0x366   :  { %2298 = vpow2.f32 %v1729_v2 }
 0x369   :  { %v1684_v9 = vpop.xlane.xlu1 %1683 }
 0x36a   :  { %v1705_v48 = vsub.f32 %v3094_v56, %v1684_v9 }
 0x36c   :  { %v3145_v12 = vpop.eup %2298  ;;  %v1731_v21 = vmul.f32 1.442695, %v1705_v48 }
 0x36d   :  { %1761 = vadd.xlane.f32.xlu1 %v3145_v12 }
 0x36e   :  { %2300 = vpow2.f32 %v1731_v21 }
 0x371   :  { %v1686_v55 = vpop.xlane.xlu2 %1685 }
 0x372   :  { %v1706_v32 = vsub.f32 %v3097_v42, %v1686_v55 }
 0x374   :  { %v3149_v63 = vpop.eup %2300  ;;  %v1733_v11 = vmul.f32 1.442695, %v1706_v32 }
 0x375   :  { %1763 = vadd.xlane.f32.xlu2 %v3149_v63 }
 0x376   :  { %2302 = vpow2.f32 %v1733_v11 }
 0x379   :  { %v1688_v24 = vpop.xlane.xlu0 %1687 }
 0x37a   :  { %v1707_v44 = vsub.f32 %v3100_v40, %v1688_v24 }
 0x37c   :  { %v3153_v0 = vpop.eup %2302  ;;  %v1735_v33 = vmul.f32 1.442695, %v1707_v44 }
 0x37d   :  { %1765 = vadd.xlane.f32.xlu0 %v3153_v0 }
 0x37e   :  { %2304 = vpow2.f32 %v1735_v33 }
 0x381   :  { %v1690_v4 = vpop.xlane.xlu1 %1689 }
 0x382   :  { %v1708_v18 = vsub.f32 %v3103_v3, %v1690_v4 }
 0x384   :  { %v3157_v56 = vpop.eup %2304  ;;  %v1737_v29 = vmul.f32 1.442695, %v1708_v18 }
 0x385   :  { %1767 = vadd.xlane.f32.xlu1 %v3157_v56 }
 0x386   :  { %2306 = vpow2.f32 %v1737_v29 }
 0x389   :  { %v1692_v42 = vpop.xlane.xlu2 %1691 }
 0x38a   :  { %v1709_v52 = vsub.f32 %v3106_v28, %v1692_v42 }
 0x38c   :  { %v3161_v22 = vpop.eup %2306  ;;  %v1739_v40 = vmul.f32 1.442695, %v1709_v52 }
 0x38d   :  { %1769 = vadd.xlane.f32.xlu2 %v3161_v22 }
 0x38e   :  { %2308 = vpow2.f32 %v1739_v40 }
 0x391   :  { %v1694_v58 = vpop.xlane.xlu0 %1693 }
 0x392   :  { %v1710_v5 = vsub.f32 %v3109_v27, %v1694_v58 }
 0x394   :  { %v3165_v41 = vpop.eup %2308  ;;  %v1741_v3 = vmul.f32 1.442695, %v1710_v5 }
 0x395   :  { %1771 = vadd.xlane.f32.xlu0 %v3165_v41 }
 0x396   :  { %2310 = vpow2.f32 %v1741_v3 }
 0x398   :  { %v1744_v19 = vpop.xlane.xlu1 %1743 }
 0x399   :  { %2312 = vrcp.f32 %v1744_v19 }
 0x39c   :  { %v3168_v49 = vpop.eup %2310 }
 0x39d   :  { %1773 = vadd.xlane.f32.xlu1 %v3168_v49 }
 0x39f   :  { %v2313_v28 = vpop.eup %2312 }
 0x3a0   :  { %v1791_v47 = vmul.f32 %v2313_v28, %v3112_v17  ;;  %v1746_v1 = vpop.xlane.xlu2 %1745 }
 0x3a1   :  { %2314 = vrcp.f32 %v1746_v1 }
 0x3a2   :  { %1807 = vst [vmem:[#allocation13] sm:$0xff] %v1791_v47 }
 0x3a7   :  { %v2315_v50 = vpop.eup %2314 }
 0x3a8   :  { %v1792_v27 = vmul.f32 %v2315_v50, %v3115_v26  ;;  %v1748_v60 = vpop.xlane.xlu0 %1747 }
 0x3a9   :  { %2316 = vrcp.f32 %v1748_v60 }
 0x3aa   :  { %1808 = vst [vmem:[#allocation13 + $0x8] sm:$0xff] %v1792_v27 }
 0x3af   :  { %v2317_v45 = vpop.eup %2316 }
 0x3b0   :  { %v1793_v43 = vmul.f32 %v2317_v45, %v3118_v10  ;;  %v1750_v59 = vpop.xlane.xlu1 %1749 }
 0x3b1   :  { %2318 = vrcp.f32 %v1750_v59 }
 0x3b2   :  { %1809 = vst [vmem:[#allocation13 + $0x10] sm:$0xff] %v1793_v43 }
 0x3b7   :  { %v2319_v30 = vpop.eup %2318 }
 0x3b8   :  { %v1794_v31 = vmul.f32 %v2319_v30, %v3121_v54  ;;  %v1752_v62 = vpop.xlane.xlu2 %1751 }
 0x3b9   :  { %2320 = vrcp.f32 %v1752_v62 }
 0x3ba   :  { %1810 = vst [vmem:[#allocation13 + $0x18] sm:$0xff] %v1794_v31 }
 0x3bf   :  { %v2321_v17 = vpop.eup %2320 }
 0x3c0   :  { %v1795_v14 = vmul.f32 %v2321_v17, %v3125_v53  ;;  %v1754_v34 = vpop.xlane.xlu0 %1753 }
 0x3c1   :  { %2322 = vrcp.f32 %v1754_v34 }
 0x3c2   :  { %1811 = vst [vmem:[#allocation13 + $0x20] sm:$0xff] %v1795_v14 }
 0x3c7   :  { %v2323_v26 = vpop.eup %2322 }
 0x3c8   :  { %v1796_v61 = vmul.f32 %v2323_v26, %v3129_v25  ;;  %v1756_v23 = vpop.xlane.xlu1 %1755 }
 0x3c9   :  { %2324 = vrcp.f32 %v1756_v23 }
 0x3ca   :  { %1812 = vst [vmem:[#allocation13 + $0x28] sm:$0xff] %v1796_v61 }
 0x3cf   :  { %v2325_v10 = vpop.eup %2324 }
 0x3d0   :  { %v1797_v15 = vmul.f32 %v2325_v10, %v3133_v7  ;;  %v1758_v36 = vpop.xlane.xlu2 %1757 }
 0x3d1   :  { %2326 = vrcp.f32 %v1758_v36 }
 0x3d2   :  { %1813 = vst [vmem:[#allocation13 + $0x30] sm:$0xff] %v1797_v15 }
 0x3d7   :  { %v2327_v54 = vpop.eup %2326 }
 0x3d8   :  { %v1798_v51 = vmul.f32 %v2327_v54, %v3137_v39  ;;  %v1760_v35 = vpop.xlane.xlu0 %1759 }
 0x3d9   :  { %2328 = vrcp.f32 %v1760_v35 }
 0x3da   :  { %1814 = vst [vmem:[#allocation13 + $0x38] sm:$0xff] %v1798_v51 }
 0x3df   :  { %v2329_v53 = vpop.eup %2328 }
 0x3e0   :  { %v1799_v37 = vmul.f32 %v2329_v53, %v3141_v6  ;;  %v1762_v13 = vpop.xlane.xlu1 %1761 }
 0x3e1   :  { %2330 = vrcp.f32 %v1762_v13 }
 0x3e2   :  { %1815 = vst [vmem:[#allocation13 + $0x40] sm:$0xff] %v1799_v37 }
 0x3e7   :  { %v2331_v25 = vpop.eup %2330 }
 0x3e8   :  { %v1800_v8 = vmul.f32 %v2331_v25, %v3145_v12  ;;  %v1764_v46 = vpop.xlane.xlu2 %1763 }
 0x3e9   :  { %2332 = vrcp.f32 %v1764_v46 }
 0x3ea   :  { %1816 = vst [vmem:[#allocation13 + $0x48] sm:$0xff] %v1800_v8 }
 0x3ef   :  { %v2333_v7 = vpop.eup %2332 }
 0x3f0   :  { %v1801_v38 = vmul.f32 %v2333_v7, %v3149_v63  ;;  %v1766_v57 = vpop.xlane.xlu0 %1765 }
 0x3f1   :  { %2334 = vrcp.f32 %v1766_v57 }
 0x3f2   :  { %1817 = vst [vmem:[#allocation13 + $0x50] sm:$0xff] %v1801_v38 }
 0x3f7   :  { %v2335_v39 = vpop.eup %2334 }
 0x3f8   :  { %v1802_v16 = vmul.f32 %v2335_v39, %v3153_v0  ;;  %v1768_v20 = vpop.xlane.xlu1 %1767 }
 0x3f9   :  { %2336 = vrcp.f32 %v1768_v20 }
 0x3fa   :  { %1818 = vst [vmem:[#allocation13 + $0x58] sm:$0xff] %v1802_v16 }
 0x3ff   :  { %v2337_v6 = vpop.eup %2336 }
 0x400   :  { %v1803_v2 = vmul.f32 %v2337_v6, %v3157_v56  ;;  %v1770_v9 = vpop.xlane.xlu2 %1769 }
 0x401   :  { %2338 = vrcp.f32 %v1770_v9 }
 0x402   :  { %1819 = vst [vmem:[#allocation13 + $0x60] sm:$0xff] %v1803_v2 }
 0x407   :  { %v2339_v48 = vpop.eup %2338 }
 0x408   :  { %v1804_v12 = vmul.f32 %v2339_v48, %v3161_v22  ;;  %v1772_v21 = vpop.xlane.xlu0 %1771 }
 0x409   :  { %2340 = vrcp.f32 %v1772_v21 }
 0x40a   :  { %1820 = vst [vmem:[#allocation13 + $0x68] sm:$0xff] %v1804_v12 }
 0x40f   :  { %v2341_v55 = vpop.eup %2340 }
 0x410   :  { %v1805_v32 = vmul.f32 %v2341_v55, %v3165_v41  ;;  %v1774_v63 = vpop.xlane.xlu1 %1773 }
 0x411   :  { %2342 = vrcp.f32 %v1774_v63 }
 0x412   :  { %1821 = vst [vmem:[#allocation13 + $0x70] sm:$0xff] %v1805_v32 }
 0x417   :  { %v2343_v11 = vpop.eup %2342 }
 0x418   :  { %v1806_v24 = vmul.f32 %v2343_v11, %v3168_v49 }
 0x41a   :  { %1822 = vst [vmem:[#allocation13 + $0x78] sm:$0xff] %v1806_v24 }
 0x41b   :  { %1835 = dma.vmem_to_hbm [thread:$0]  %s1828_s3, 2048, %s1830_s25, [#allocation4], %s2527_s27, %s2527_s27, %s2528_s28  }
 0x41c   :  { %2520 = dma.done.wait [#allocation4], 2048  }
 0x41d   :  { %2521 = vsyncadd [#allocation4], 4294965248 }
 0x41e   :  { %1840 = vsyncpa [#allocation3], 1 }
 0x41f   :  { %1841 = vsyncpa [#allocation6], 1 }
 0x420   :  { %1842 = vsyncpa [#allocation9], 1 }
 0x421   :  { %1843 = vsyncpa [#allocation12], 1 }
 0x422   :  { %1844 = vsyncpa [#allocation4], 1 }

</bundles_post_ra>
